<compile_context>
chip_gen: v5e
topology: v5e:2x2
jax: 0.10.0
libtpu: 0.0.40
codegen_flags: <defaults>
</compile_context>

<pallas_src>
import functools

import jax
import jax.numpy as jnp
from jax.experimental import pallas as pl
from jax.experimental.pallas import tpu as pltpu

INPUT_DIM = 10
OUTPUT_DIM = 10
HIDDEN_DIM = 16
N_LAYERS = 2  # kernel below is written for exactly 2 layers (the module fixes n_layers=2)

GATE_ORDER = ("i", "f", "o", "g")  # column-block order of the fused 8H gate layout


# ----------------------------- Pallas kernel ---------------------------------

def seq2seq_kernel(src_ref, tgt_ref,
                   wpe_ref, be8_ref, wpd_ref, bd8_ref, delta_ref, a_last_ref,
                   w_enc_ref, w_encb_ref, w_dec_ref,
                   fc_w_ref, fc_b_ref,
                   out_ref, *, t_src, t_tgt, batch):
    H = HIDDEN_DIM
    B = batch
    TH = 2 * H   # packed state width: lanes [0:H] = layer-1, [H:2H] = layer-0
    H8 = 8 * H   # fused gate width:   [i1 i0 | f1 f0 | o1 o0 | g1 g0]

    # Hoist all recurrent weights out of the unrolled recurrence (loaded once).
    w_enc = w_enc_ref[...]       # (2H, 8H)  encoder steps
    w_encb = w_encb_ref[...]     # (2H, 8H)  encoder->decoder boundary step
    w_dec = w_dec_ref[...]       # (2H, 8H)  decoder steps

    # Layer-0 input projections for ALL timesteps (one matmul per LSTM, off the
    # serial chain), emitted directly in the fused 8H gate layout.  Layer-1 gate
    # columns of the projection weights are zero; the bias rows carry both the
    # layer-0 and layer-1 biases.
    xe8 = jnp.dot(src_ref[...], wpe_ref[...],
                  preferred_element_type=jnp.float32) + be8_ref[...]   # (T_src*B, 8H)
    xd8 = jnp.dot(tgt_ref[...], wpd_ref[...],
                  preferred_element_type=jnp.float32) + bd8_ref[...]   # (T_tgt*B, 8H)

    def apply_gates8(gates, c_packed):
        # gates: (B, 8H).  One sigmoid + one tanh over the full 128-lane vreg (EUP),
        # then lane-aligned (B, 2H) element-wise updates for BOTH layers at once.
        sg = jax.nn.sigmoid(gates)
        tg = jnp.tanh(gates)
        i = sg[:, 0 * TH:1 * TH]
        f = sg[:, 1 * TH:2 * TH]
        o = sg[:, 2 * TH:3 * TH]
        g = tg[:, 3 * TH:4 * TH]
        c_new = f * c_packed + i * g
        h_new = o * jnp.tanh(c_new)
        return h_new, c_new

    # Per-iteration additive term (x-projection / bias) and RHS schedule.
    # Iteration k handles layer-1 gates for global step k and layer-0 gates for
    # global step k+1 (global steps: enc 0..T_src-1 then dec 0..T_tgt-1).
    adds = [xe8[t * B:(t + 1) * B, :] for t in range(1, t_src)]
    adds.append(xd8[0:B, :] + delta_ref[...])           # boundary: dec x[0], enc layer-1 bias
    adds += [xd8[t * B:(t + 1) * B, :] for t in range(1, t_tgt)]
    adds.append(a_last_ref[...])                         # last step: layer-0 half unused
    rhss = [w_enc] * (t_src - 1) + [w_encb] + [w_dec] * t_tgt

    # Prologue: encoder step 0, layer 0 only.  Zero initial state -> no hh matmul.
    # Run the combined update on XE[0] and zero the (meaningless) layer-1 half.
    lane = jax.lax.broadcasted_iota(jnp.int32, (B, TH), 1)
    keep_l0 = (lane >= H).astype(jnp.float32)
    h_p, c_p = apply_gates8(xe8[0:B, :], jnp.zeros((B, TH), jnp.float32))
    h_p = h_p * keep_l0
    c_p = c_p * keep_l0

    # Retimed recurrence: ONE fused (B,2H)@(2H,8H) matmul per step; the packed state
    # [h1 | h0] is both the matmul LHS and the apply_gates output -> no per-step concat.
    dec_h = []
    for k in range(t_src + t_tgt):
        fused = jnp.dot(h_p, rhss[k], preferred_element_type=jnp.float32)
        h_p, c_p = apply_gates8(fused + adds[k], c_p)
        if k >= t_src:                      # decoder layer-1 outputs
            dec_h.append(h_p)

    # FC hoisted out of the loop: one matmul + one dense store.  The layer-0 lanes
    # of the packed state hit zero weight rows.
    hs = jnp.concatenate(dec_h, axis=0)                                # (T_tgt*B, 2H)
    preds = jnp.dot(hs, fc_w_ref[...],
                    preferred_element_type=jnp.float32) + fc_b_ref[...]
    out_ref[...] = preds.astype(out_ref.dtype)


# ----------------------- wrapper-side weight preparation ----------------------

def _gate(w, name):
    H = HIDDEN_DIM
    idx = {"i": 0, "f": 1, "g": 2, "o": 3}[name]   # PyTorch row order (i, f, g, o)
    return w[idx * H:(idx + 1) * H]


def _proj_weight(w_ih0):
    """(in_dim, 8H): layer-0 gate columns hold W_ih0^T per gate; layer-1 columns zero."""
    in_dim = w_ih0.shape[1]
    H = HIDDEN_DIM
    cols = []
    for g in GATE_ORDER:
        cols.append(jnp.zeros((in_dim, H), jnp.float32))                  # layer-1 block
        cols.append(jnp.asarray(_gate(w_ih0, g).T, jnp.float32))          # layer-0 block
    return jnp.concatenate(cols, axis=1)


def _block_rhs(w_ih1, w_hh1, w_hh0):
    """(2H, 8H): rows [0:H] multiply h1(t-1), rows [H:2H] multiply h0(t)."""
    H = HIDDEN_DIM
    cols = []
    for g in GATE_ORDER:
        l1 = jnp.concatenate([jnp.asarray(_gate(w_hh1, g).T, jnp.float32),
                              jnp.asarray(_gate(w_ih1, g).T, jnp.float32)], axis=0)
        l0 = jnp.concatenate([jnp.zeros((H, H), jnp.float32),
                              jnp.asarray(_gate(w_hh0, g).T, jnp.float32)], axis=0)
        cols += [l1, l0]
    return jnp.concatenate(cols, axis=1)


def _bias8(b1, b0):
    """(1, 8H) with layer-1 bias b1 / layer-0 bias b0 interleaved per gate block."""
    segs = []
    for g in GATE_ORDER:
        segs.append(_gate(b1, g))
        segs.append(_gate(b0, g))
    return jnp.asarray(jnp.concatenate(segs)[None, :], jnp.float32)


# ------------------------------ wrapper ---------------------------------------

def seq2seq_forward(src, tgt, params):
    """src: (B, T_src, input_dim), tgt: (B, T_tgt, output_dim) -> (B, T_tgt, output_dim)."""
    B, T_src, _ = src.shape
    _, T_tgt, _ = tgt.shape
    H = HIDDEN_DIM

    # Time-major then flatten to (T*B, D) so each layer-0 projection is one matmul.
    src_flat = jnp.transpose(src, (1, 0, 2)).reshape(T_src * B, INPUT_DIM).astype(jnp.float32)
    tgt_flat = jnp.transpose(tgt, (1, 0, 2)).reshape(T_tgt * B, OUTPUT_DIM).astype(jnp.float32)

    e0_wih, e0_whh, e0_bih, e0_bhh = params["enc0"]
    e1_wih, e1_whh, e1_bih, e1_bhh = params["enc1"]
    d0_wih, d0_whh, d0_bih, d0_bhh = params["dec0"]
    d1_wih, d1_whh, d1_bih, d1_bhh = params["dec1"]

    b_e0, b_e1 = e0_bih + e0_bhh, e1_bih + e1_bhh
    b_d0, b_d1 = d0_bih + d0_bhh, d1_bih + d1_bhh
    zeros4h = jnp.zeros_like(b_e0)

    wpe = _proj_weight(e0_wih)                     # (INPUT_DIM, 8H)
    wpd = _proj_weight(d0_wih)                     # (OUTPUT_DIM, 8H)
    be8 = _bias8(b_e1, b_e0)                       # (1, 8H)
    bd8 = _bias8(b_d1, b_d0)                       # (1, 8H)
    delta = _bias8(b_e1 - b_d1, zeros4h)           # boundary: swap layer-1 bias to encoder's
    a_last = _bias8(b_d1, zeros4h)                 # final iteration: layer-0 half unused

    w_enc = _block_rhs(e1_wih, e1_whh, e0_whh)     # encoder steps
    w_encb = _block_rhs(e1_wih, e1_whh, d0_whh)    # boundary: enc layer-1, dec layer-0 hh
    w_dec = _block_rhs(d1_wih, d1_whh, d0_whh)     # decoder steps

    fc_w2 = jnp.concatenate([jnp.asarray(params["fc_w"].T, jnp.float32),
                             jnp.zeros((H, OUTPUT_DIM), jnp.float32)], axis=0)  # (2H, OUT)
    fc_b = jnp.asarray(params["fc_b"][None, :], jnp.float32)

    args = [src_flat, tgt_flat, wpe, be8, wpd, bd8, delta, a_last,
            w_enc, w_encb, w_dec, fc_w2, fc_b]

    vmem = pl.BlockSpec(memory_space=pltpu.MemorySpace.VMEM)
    out_flat = pl.pallas_call(
        functools.partial(seq2seq_kernel, t_src=T_src, t_tgt=T_tgt, batch=B),
        out_shape=jax.ShapeDtypeStruct((T_tgt * B, OUTPUT_DIM), jnp.float32),
        in_specs=[vmem] * len(args),
        out_specs=vmem,
    )(*args)

    # (T_tgt*B, D) -> (T_tgt, B, D) -> batch-first (B, T_tgt, D)
    return jnp.transpose(out_flat.reshape(T_tgt, B, OUTPUT_DIM), (1, 0, 2))


# ------------------------- deterministic parameter init -----------------------

def init_params(key):
    H = HIDDEN_DIM
    bound = 1.0 / (H ** 0.5)  # PyTorch default LSTM/Linear init range
    params = {}
    for lstm, in_dim in (("enc", INPUT_DIM), ("dec", OUTPUT_DIM)):
        for l in range(N_LAYERS):
            d = in_dim if l == 0 else H
            key, k1, k2, k3, k4 = jax.random.split(key, 5)
            params[f"{lstm}{l}"] = (
                jax.random.uniform(k1, (4 * H, d), jnp.float32, -bound, bound),   # W_ih
                jax.random.uniform(k2, (4 * H, H), jnp.float32, -bound, bound),   # W_hh
                jax.random.uniform(k3, (4 * H,), jnp.float32, -bound, bound),     # b_ih
                jax.random.uniform(k4, (4 * H,), jnp.float32, -bound, bound),     # b_hh
            )
    key, k1, k2 = jax.random.split(key, 3)
    params["fc_w"] = jax.random.uniform(k1, (OUTPUT_DIM, H), jnp.float32, -bound, bound)
    params["fc_b"] = jax.random.uniform(k2, (OUTPUT_DIM,), jnp.float32, -bound, bound)
    return params


# ----------------------------- pure-JAX reference -----------------------------

def reference_forward(src, tgt, params):
    hp = jax.lax.Precision.HIGHEST

    def cell(x, h, c, w_ih, w_hh, b_ih, b_hh):
        gates = (jnp.dot(x, w_ih.T, precision=hp)
                 + jnp.dot(h, w_hh.T, precision=hp) + b_ih + b_hh)
        i, f, g, o = jnp.split(gates, 4, axis=-1)
        c = jax.nn.sigmoid(f) * c + jax.nn.sigmoid(i) * jnp.tanh(g)
        h = jax.nn.sigmoid(o) * jnp.tanh(c)
        return h, c

    def run_lstm(x, h_init, c_init, layers):
        hs, cs = [], []
        for li, layer in enumerate(layers):
            h, c = h_init[li], c_init[li]
            outs = []
            for t in range(x.shape[1]):
                h, c = cell(x[:, t], h, c, *layer)
                outs.append(h)
            x = jnp.stack(outs, axis=1)
            hs.append(h)
            cs.append(c)
        return x, jnp.stack(hs), jnp.stack(cs)

    B = src.shape[0]
    zeros = jnp.zeros((N_LAYERS, B, HIDDEN_DIM), jnp.float32)
    _, h, c = run_lstm(src.astype(jnp.float32), zeros, zeros,
                       [params["enc0"], params["enc1"]])
    outs, _, _ = run_lstm(tgt.astype(jnp.float32), h, c,
                          [params["dec0"], params["dec1"]])
    return jnp.dot(outs, params["fc_w"].T, precision=hp) + params["fc_b"]


# ----------------------------------- main --------------------------------------

if __name__ == "__main__":
    key = jax.random.PRNGKey(0)
    key, k_src, k_tgt, k_par = jax.random.split(key, 4)

    B, T_SRC, T_TGT = 2, 8, 8
    src = jax.random.normal(k_src, (B, T_SRC, INPUT_DIM), jnp.float32)
    tgt = jax.random.normal(k_tgt, (B, T_TGT, OUTPUT_DIM), jnp.float32)
    params = init_params(k_par)

    preds = seq2seq_forward(src, tgt, params)
    preds = jax.block_until_ready(preds)

    ref = jax.block_until_ready(reference_forward(src, tgt, params))
    assert preds.shape == (B, T_TGT, OUTPUT_DIM), preds.shape
    max_err = float(jnp.abs(preds - ref).max())
    assert jnp.allclose(preds, ref, atol=5e-4, rtol=5e-4), max_err

    print("KERNEL_OK")
</pallas_src>

<mosaic_0001>
module attributes {stable_mosaic.version = 11 : i64} {
  func.func @seq2seq_kernel(%arg0: memref<16x10xf32, #tpu.memory_space<vmem>>, %arg1: memref<16x10xf32, #tpu.memory_space<vmem>>, %arg2: memref<10x128xf32, #tpu.memory_space<vmem>>, %arg3: memref<1x128xf32, #tpu.memory_space<vmem>>, %arg4: memref<10x128xf32, #tpu.memory_space<vmem>>, %arg5: memref<1x128xf32, #tpu.memory_space<vmem>>, %arg6: memref<1x128xf32, #tpu.memory_space<vmem>>, %arg7: memref<1x128xf32, #tpu.memory_space<vmem>>, %arg8: memref<32x128xf32, #tpu.memory_space<vmem>>, %arg9: memref<32x128xf32, #tpu.memory_space<vmem>>, %arg10: memref<32x128xf32, #tpu.memory_space<vmem>>, %arg11: memref<32x10xf32, #tpu.memory_space<vmem>>, %arg12: memref<1x10xf32, #tpu.memory_space<vmem>>, %arg13: memref<16x10xf32, #tpu.memory_space<vmem>>) attributes {dimension_semantics = [], scalar_prefetch = 0 : i64, scratch_operands = 0 : i64, tpu.core_type = #tpu.core_type<tc>} {
    %c0 = arith.constant 0 : index
    %c0_0 = arith.constant 0 : index
    %0 = vector.load %arg8[%c0, %c0_0] : memref<32x128xf32, #tpu.memory_space<vmem>>, vector<32x128xf32>
    %c0_1 = arith.constant 0 : index
    %c0_2 = arith.constant 0 : index
    %1 = vector.load %arg9[%c0_1, %c0_2] : memref<32x128xf32, #tpu.memory_space<vmem>>, vector<32x128xf32>
    %c0_3 = arith.constant 0 : index
    %c0_4 = arith.constant 0 : index
    %2 = vector.load %arg10[%c0_3, %c0_4] : memref<32x128xf32, #tpu.memory_space<vmem>>, vector<32x128xf32>
    %c0_5 = arith.constant 0 : index
    %c0_6 = arith.constant 0 : index
    %3 = vector.load %arg0[%c0_5, %c0_6] : memref<16x10xf32, #tpu.memory_space<vmem>>, vector<16x10xf32>
    %c0_7 = arith.constant 0 : index
    %c0_8 = arith.constant 0 : index
    %4 = vector.load %arg2[%c0_7, %c0_8] : memref<10x128xf32, #tpu.memory_space<vmem>>, vector<10x128xf32>
    %cst = arith.constant dense<0.000000e+00> : vector<16x128xf32>
    %5 = tpu.matmul %3, %4, %cst {dimension_numbers = #tpu.dot_dimension_numbers<[1], [0], [0], [1], [0, 0, 1, 1], [], []>} : vector<16x10xf32>, vector<10x128xf32>, vector<16x128xf32> -> vector<16x128xf32>
    %c0_9 = arith.constant 0 : index
    %c0_10 = arith.constant 0 : index
    %6 = vector.load %arg3[%c0_9, %c0_10] : memref<1x128xf32, #tpu.memory_space<vmem>>, vector<1x128xf32>
    %7 = vector.broadcast %6 : vector<1x128xf32> to vector<16x128xf32>
    %8 = arith.addf %5, %7 : vector<16x128xf32>
    %c0_11 = arith.constant 0 : index
    %c0_12 = arith.constant 0 : index
    %9 = vector.load %arg1[%c0_11, %c0_12] : memref<16x10xf32, #tpu.memory_space<vmem>>, vector<16x10xf32>
    %c0_13 = arith.constant 0 : index
    %c0_14 = arith.constant 0 : index
    %10 = vector.load %arg4[%c0_13, %c0_14] : memref<10x128xf32, #tpu.memory_space<vmem>>, vector<10x128xf32>
    %cst_15 = arith.constant dense<0.000000e+00> : vector<16x128xf32>
    %11 = tpu.matmul %9, %10, %cst_15 {dimension_numbers = #tpu.dot_dimension_numbers<[1], [0], [0], [1], [0, 0, 1, 1], [], []>} : vector<16x10xf32>, vector<10x128xf32>, vector<16x128xf32> -> vector<16x128xf32>
    %c0_16 = arith.constant 0 : index
    %c0_17 = arith.constant 0 : index
    %12 = vector.load %arg5[%c0_16, %c0_17] : memref<1x128xf32, #tpu.memory_space<vmem>>, vector<1x128xf32>
    %13 = vector.broadcast %12 : vector<1x128xf32> to vector<16x128xf32>
    %14 = arith.addf %11, %13 : vector<16x128xf32>
    %15 = vector.extract_strided_slice %8 {offsets = [2, 0], sizes = [2, 128], strides = [1, 1]} : vector<16x128xf32> to vector<2x128xf32>
    %16 = vector.extract_strided_slice %8 {offsets = [4, 0], sizes = [2, 128], strides = [1, 1]} : vector<16x128xf32> to vector<2x128xf32>
    %17 = vector.extract_strided_slice %8 {offsets = [6, 0], sizes = [2, 128], strides = [1, 1]} : vector<16x128xf32> to vector<2x128xf32>
    %18 = vector.extract_strided_slice %8 {offsets = [8, 0], sizes = [2, 128], strides = [1, 1]} : vector<16x128xf32> to vector<2x128xf32>
    %19 = vector.extract_strided_slice %8 {offsets = [10, 0], sizes = [2, 128], strides = [1, 1]} : vector<16x128xf32> to vector<2x128xf32>
    %20 = vector.extract_strided_slice %8 {offsets = [12, 0], sizes = [2, 128], strides = [1, 1]} : vector<16x128xf32> to vector<2x128xf32>
    %21 = vector.extract_strided_slice %8 {offsets = [14, 0], sizes = [2, 128], strides = [1, 1]} : vector<16x128xf32> to vector<2x128xf32>
    %22 = vector.extract_strided_slice %14 {offsets = [0, 0], sizes = [2, 128], strides = [1, 1]} : vector<16x128xf32> to vector<2x128xf32>
    %c0_18 = arith.constant 0 : index
    %c0_19 = arith.constant 0 : index
    %23 = vector.load %arg6[%c0_18, %c0_19] : memref<1x128xf32, #tpu.memory_space<vmem>>, vector<1x128xf32>
    %24 = vector.broadcast %23 : vector<1x128xf32> to vector<2x128xf32>
    %25 = arith.addf %22, %24 : vector<2x128xf32>
    %26 = vector.extract_strided_slice %14 {offsets = [2, 0], sizes = [2, 128], strides = [1, 1]} : vector<16x128xf32> to vector<2x128xf32>
    %27 = vector.extract_strided_slice %14 {offsets = [4, 0], sizes = [2, 128], strides = [1, 1]} : vector<16x128xf32> to vector<2x128xf32>
    %28 = vector.extract_strided_slice %14 {offsets = [6, 0], sizes = [2, 128], strides = [1, 1]} : vector<16x128xf32> to vector<2x128xf32>
    %29 = vector.extract_strided_slice %14 {offsets = [8, 0], sizes = [2, 128], strides = [1, 1]} : vector<16x128xf32> to vector<2x128xf32>
    %30 = vector.extract_strided_slice %14 {offsets = [10, 0], sizes = [2, 128], strides = [1, 1]} : vector<16x128xf32> to vector<2x128xf32>
    %31 = vector.extract_strided_slice %14 {offsets = [12, 0], sizes = [2, 128], strides = [1, 1]} : vector<16x128xf32> to vector<2x128xf32>
    %32 = vector.extract_strided_slice %14 {offsets = [14, 0], sizes = [2, 128], strides = [1, 1]} : vector<16x128xf32> to vector<2x128xf32>
    %c0_20 = arith.constant 0 : index
    %c0_21 = arith.constant 0 : index
    %33 = vector.load %arg7[%c0_20, %c0_21] : memref<1x128xf32, #tpu.memory_space<vmem>>, vector<1x128xf32>
    %34 = tpu.iota {dimensions = array<i32: 1>} : vector<2x32xi32>
    %c16_i32 = arith.constant 16 : i32
    %35 = vector.broadcast %c16_i32 : i32 to vector<2x32xi32>
    %36 = arith.cmpi sge, %34, %35 : vector<2x32xi32>
    %37 = arith.extui %36 : vector<2x32xi1> to vector<2x32xi32>
    %38 = arith.sitofp %37 : vector<2x32xi32> to vector<2x32xf32>
    %39 = vector.extract_strided_slice %8 {offsets = [0, 0], sizes = [2, 128], strides = [1, 1]} : vector<16x128xf32> to vector<2x128xf32>
    %cst_22 = arith.constant 0.000000e+00 : f32
    %40 = vector.broadcast %cst_22 : f32 to vector<2x32xf32>
    %41 = arith.negf %39 : vector<2x128xf32>
    %42 = math.exp %41 : vector<2x128xf32>
    %cst_23 = arith.constant 1.000000e+00 : f32
    %43 = vector.broadcast %cst_23 : f32 to vector<2x128xf32>
    %44 = arith.addf %43, %42 : vector<2x128xf32>
    %45 = arith.divf %43, %44 : vector<2x128xf32>
    %46 = math.tanh %39 : vector<2x128xf32>
    %47 = vector.extract_strided_slice %45 {offsets = [0, 0], sizes = [2, 32], strides = [1, 1]} : vector<2x128xf32> to vector<2x32xf32>
    %48 = vector.extract_strided_slice %45 {offsets = [0, 32], sizes = [2, 32], strides = [1, 1]} : vector<2x128xf32> to vector<2x32xf32>
    %49 = vector.extract_strided_slice %45 {offsets = [0, 64], sizes = [2, 32], strides = [1, 1]} : vector<2x128xf32> to vector<2x32xf32>
    %50 = vector.extract_strided_slice %46 {offsets = [0, 96], sizes = [2, 32], strides = [1, 1]} : vector<2x128xf32> to vector<2x32xf32>
    %51 = arith.mulf %48, %40 : vector<2x32xf32>
    %52 = arith.mulf %47, %50 : vector<2x32xf32>
    %53 = arith.addf %51, %52 : vector<2x32xf32>
    %54 = math.tanh %53 : vector<2x32xf32>
    %55 = arith.mulf %49, %54 : vector<2x32xf32>
    %56 = arith.mulf %55, %38 : vector<2x32xf32>
    %57 = arith.mulf %53, %38 : vector<2x32xf32>
    %cst_24 = arith.constant dense<0.000000e+00> : vector<2x128xf32>
    %58 = tpu.matmul %56, %0, %cst_24 {dimension_numbers = #tpu.dot_dimension_numbers<[1], [0], [0], [1], [0, 0, 1, 1], [], []>} : vector<2x32xf32>, vector<32x128xf32>, vector<2x128xf32> -> vector<2x128xf32>
    %59 = arith.addf %58, %15 : vector<2x128xf32>
    %60 = arith.negf %59 : vector<2x128xf32>
    %61 = math.exp %60 : vector<2x128xf32>
    %cst_25 = arith.constant 1.000000e+00 : f32
    %62 = vector.broadcast %cst_25 : f32 to vector<2x128xf32>
    %63 = arith.addf %62, %61 : vector<2x128xf32>
    %64 = arith.divf %62, %63 : vector<2x128xf32>
    %65 = math.tanh %59 : vector<2x128xf32>
    %66 = vector.extract_strided_slice %64 {offsets = [0, 0], sizes = [2, 32], strides = [1, 1]} : vector<2x128xf32> to vector<2x32xf32>
    %67 = vector.extract_strided_slice %64 {offsets = [0, 32], sizes = [2, 32], strides = [1, 1]} : vector<2x128xf32> to vector<2x32xf32>
    %68 = vector.extract_strided_slice %64 {offsets = [0, 64], sizes = [2, 32], strides = [1, 1]} : vector<2x128xf32> to vector<2x32xf32>
    %69 = vector.extract_strided_slice %65 {offsets = [0, 96], sizes = [2, 32], strides = [1, 1]} : vector<2x128xf32> to vector<2x32xf32>
    %70 = arith.mulf %67, %57 : vector<2x32xf32>
    %71 = arith.mulf %66, %69 : vector<2x32xf32>
    %72 = arith.addf %70, %71 : vector<2x32xf32>
    %73 = math.tanh %72 : vector<2x32xf32>
    %74 = arith.mulf %68, %73 : vector<2x32xf32>
    %cst_26 = arith.constant dense<0.000000e+00> : vector<2x128xf32>
    %75 = tpu.matmul %74, %0, %cst_26 {dimension_numbers = #tpu.dot_dimension_numbers<[1], [0], [0], [1], [0, 0, 1, 1], [], []>} : vector<2x32xf32>, vector<32x128xf32>, vector<2x128xf32> -> vector<2x128xf32>
    %76 = arith.addf %75, %16 : vector<2x128xf32>
    %77 = arith.negf %76 : vector<2x128xf32>
    %78 = math.exp %77 : vector<2x128xf32>
    %cst_27 = arith.constant 1.000000e+00 : f32
    %79 = vector.broadcast %cst_27 : f32 to vector<2x128xf32>
    %80 = arith.addf %79, %78 : vector<2x128xf32>
    %81 = arith.divf %79, %80 : vector<2x128xf32>
    %82 = math.tanh %76 : vector<2x128xf32>
    %83 = vector.extract_strided_slice %81 {offsets = [0, 0], sizes = [2, 32], strides = [1, 1]} : vector<2x128xf32> to vector<2x32xf32>
    %84 = vector.extract_strided_slice %81 {offsets = [0, 32], sizes = [2, 32], strides = [1, 1]} : vector<2x128xf32> to vector<2x32xf32>
    %85 = vector.extract_strided_slice %81 {offsets = [0, 64], sizes = [2, 32], strides = [1, 1]} : vector<2x128xf32> to vector<2x32xf32>
    %86 = vector.extract_strided_slice %82 {offsets = [0, 96], sizes = [2, 32], strides = [1, 1]} : vector<2x128xf32> to vector<2x32xf32>
    %87 = arith.mulf %84, %72 : vector<2x32xf32>
    %88 = arith.mulf %83, %86 : vector<2x32xf32>
    %89 = arith.addf %87, %88 : vector<2x32xf32>
    %90 = math.tanh %89 : vector<2x32xf32>
    %91 = arith.mulf %85, %90 : vector<2x32xf32>
    %cst_28 = arith.constant dense<0.000000e+00> : vector<2x128xf32>
    %92 = tpu.matmul %91, %0, %cst_28 {dimension_numbers = #tpu.dot_dimension_numbers<[1], [0], [0], [1], [0, 0, 1, 1], [], []>} : vector<2x32xf32>, vector<32x128xf32>, vector<2x128xf32> -> vector<2x128xf32>
    %93 = arith.addf %92, %17 : vector<2x128xf32>
    %94 = arith.negf %93 : vector<2x128xf32>
    %95 = math.exp %94 : vector<2x128xf32>
    %cst_29 = arith.constant 1.000000e+00 : f32
    %96 = vector.broadcast %cst_29 : f32 to vector<2x128xf32>
    %97 = arith.addf %96, %95 : vector<2x128xf32>
    %98 = arith.divf %96, %97 : vector<2x128xf32>
    %99 = math.tanh %93 : vector<2x128xf32>
    %100 = vector.extract_strided_slice %98 {offsets = [0, 0], sizes = [2, 32], strides = [1, 1]} : vector<2x128xf32> to vector<2x32xf32>
    %101 = vector.extract_strided_slice %98 {offsets = [0, 32], sizes = [2, 32], strides = [1, 1]} : vector<2x128xf32> to vector<2x32xf32>
    %102 = vector.extract_strided_slice %98 {offsets = [0, 64], sizes = [2, 32], strides = [1, 1]} : vector<2x128xf32> to vector<2x32xf32>
    %103 = vector.extract_strided_slice %99 {offsets = [0, 96], sizes = [2, 32], strides = [1, 1]} : vector<2x128xf32> to vector<2x32xf32>
    %104 = arith.mulf %101, %89 : vector<2x32xf32>
    %105 = arith.mulf %100, %103 : vector<2x32xf32>
    %106 = arith.addf %104, %105 : vector<2x32xf32>
    %107 = math.tanh %106 : vector<2x32xf32>
    %108 = arith.mulf %102, %107 : vector<2x32xf32>
    %cst_30 = arith.constant dense<0.000000e+00> : vector<2x128xf32>
    %109 = tpu.matmul %108, %0, %cst_30 {dimension_numbers = #tpu.dot_dimension_numbers<[1], [0], [0], [1], [0, 0, 1, 1], [], []>} : vector<2x32xf32>, vector<32x128xf32>, vector<2x128xf32> -> vector<2x128xf32>
    %110 = arith.addf %109, %18 : vector<2x128xf32>
    %111 = arith.negf %110 : vector<2x128xf32>
    %112 = math.exp %111 : vector<2x128xf32>
    %cst_31 = arith.constant 1.000000e+00 : f32
    %113 = vector.broadcast %cst_31 : f32 to vector<2x128xf32>
    %114 = arith.addf %113, %112 : vector<2x128xf32>
    %115 = arith.divf %113, %114 : vector<2x128xf32>
    %116 = math.tanh %110 : vector<2x128xf32>
    %117 = vector.extract_strided_slice %115 {offsets = [0, 0], sizes = [2, 32], strides = [1, 1]} : vector<2x128xf32> to vector<2x32xf32>
    %118 = vector.extract_strided_slice %115 {offsets = [0, 32], sizes = [2, 32], strides = [1, 1]} : vector<2x128xf32> to vector<2x32xf32>
    %119 = vector.extract_strided_slice %115 {offsets = [0, 64], sizes = [2, 32], strides = [1, 1]} : vector<2x128xf32> to vector<2x32xf32>
    %120 = vector.extract_strided_slice %116 {offsets = [0, 96], sizes = [2, 32], strides = [1, 1]} : vector<2x128xf32> to vector<2x32xf32>
    %121 = arith.mulf %118, %106 : vector<2x32xf32>
    %122 = arith.mulf %117, %120 : vector<2x32xf32>
    %123 = arith.addf %121, %122 : vector<2x32xf32>
    %124 = math.tanh %123 : vector<2x32xf32>
    %125 = arith.mulf %119, %124 : vector<2x32xf32>
    %cst_32 = arith.constant dense<0.000000e+00> : vector<2x128xf32>
    %126 = tpu.matmul %125, %0, %cst_32 {dimension_numbers = #tpu.dot_dimension_numbers<[1], [0], [0], [1], [0, 0, 1, 1], [], []>} : vector<2x32xf32>, vector<32x128xf32>, vector<2x128xf32> -> vector<2x128xf32>
    %127 = arith.addf %126, %19 : vector<2x128xf32>
    %128 = arith.negf %127 : vector<2x128xf32>
    %129 = math.exp %128 : vector<2x128xf32>
    %cst_33 = arith.constant 1.000000e+00 : f32
    %130 = vector.broadcast %cst_33 : f32 to vector<2x128xf32>
    %131 = arith.addf %130, %129 : vector<2x128xf32>
    %132 = arith.divf %130, %131 : vector<2x128xf32>
    %133 = math.tanh %127 : vector<2x128xf32>
    %134 = vector.extract_strided_slice %132 {offsets = [0, 0], sizes = [2, 32], strides = [1, 1]} : vector<2x128xf32> to vector<2x32xf32>
    %135 = vector.extract_strided_slice %132 {offsets = [0, 32], sizes = [2, 32], strides = [1, 1]} : vector<2x128xf32> to vector<2x32xf32>
    %136 = vector.extract_strided_slice %132 {offsets = [0, 64], sizes = [2, 32], strides = [1, 1]} : vector<2x128xf32> to vector<2x32xf32>
    %137 = vector.extract_strided_slice %133 {offsets = [0, 96], sizes = [2, 32], strides = [1, 1]} : vector<2x128xf32> to vector<2x32xf32>
    %138 = arith.mulf %135, %123 : vector<2x32xf32>
    %139 = arith.mulf %134, %137 : vector<2x32xf32>
    %140 = arith.addf %138, %139 : vector<2x32xf32>
    %141 = math.tanh %140 : vector<2x32xf32>
    %142 = arith.mulf %136, %141 : vector<2x32xf32>
    %cst_34 = arith.constant dense<0.000000e+00> : vector<2x128xf32>
    %143 = tpu.matmul %142, %0, %cst_34 {dimension_numbers = #tpu.dot_dimension_numbers<[1], [0], [0], [1], [0, 0, 1, 1], [], []>} : vector<2x32xf32>, vector<32x128xf32>, vector<2x128xf32> -> vector<2x128xf32>
    %144 = arith.addf %143, %20 : vector<2x128xf32>
    %145 = arith.negf %144 : vector<2x128xf32>
    %146 = math.exp %145 : vector<2x128xf32>
    %cst_35 = arith.constant 1.000000e+00 : f32
    %147 = vector.broadcast %cst_35 : f32 to vector<2x128xf32>
    %148 = arith.addf %147, %146 : vector<2x128xf32>
    %149 = arith.divf %147, %148 : vector<2x128xf32>
    %150 = math.tanh %144 : vector<2x128xf32>
    %151 = vector.extract_strided_slice %149 {offsets = [0, 0], sizes = [2, 32], strides = [1, 1]} : vector<2x128xf32> to vector<2x32xf32>
    %152 = vector.extract_strided_slice %149 {offsets = [0, 32], sizes = [2, 32], strides = [1, 1]} : vector<2x128xf32> to vector<2x32xf32>
    %153 = vector.extract_strided_slice %149 {offsets = [0, 64], sizes = [2, 32], strides = [1, 1]} : vector<2x128xf32> to vector<2x32xf32>
    %154 = vector.extract_strided_slice %150 {offsets = [0, 96], sizes = [2, 32], strides = [1, 1]} : vector<2x128xf32> to vector<2x32xf32>
    %155 = arith.mulf %152, %140 : vector<2x32xf32>
    %156 = arith.mulf %151, %154 : vector<2x32xf32>
    %157 = arith.addf %155, %156 : vector<2x32xf32>
    %158 = math.tanh %157 : vector<2x32xf32>
    %159 = arith.mulf %153, %158 : vector<2x32xf32>
    %cst_36 = arith.constant dense<0.000000e+00> : vector<2x128xf32>
    %160 = tpu.matmul %159, %0, %cst_36 {dimension_numbers = #tpu.dot_dimension_numbers<[1], [0], [0], [1], [0, 0, 1, 1], [], []>} : vector<2x32xf32>, vector<32x128xf32>, vector<2x128xf32> -> vector<2x128xf32>
    %161 = arith.addf %160, %21 : vector<2x128xf32>
    %162 = arith.negf %161 : vector<2x128xf32>
    %163 = math.exp %162 : vector<2x128xf32>
    %cst_37 = arith.constant 1.000000e+00 : f32
    %164 = vector.broadcast %cst_37 : f32 to vector<2x128xf32>
    %165 = arith.addf %164, %163 : vector<2x128xf32>
    %166 = arith.divf %164, %165 : vector<2x128xf32>
    %167 = math.tanh %161 : vector<2x128xf32>
    %168 = vector.extract_strided_slice %166 {offsets = [0, 0], sizes = [2, 32], strides = [1, 1]} : vector<2x128xf32> to vector<2x32xf32>
    %169 = vector.extract_strided_slice %166 {offsets = [0, 32], sizes = [2, 32], strides = [1, 1]} : vector<2x128xf32> to vector<2x32xf32>
    %170 = vector.extract_strided_slice %166 {offsets = [0, 64], sizes = [2, 32], strides = [1, 1]} : vector<2x128xf32> to vector<2x32xf32>
    %171 = vector.extract_strided_slice %167 {offsets = [0, 96], sizes = [2, 32], strides = [1, 1]} : vector<2x128xf32> to vector<2x32xf32>
    %172 = arith.mulf %169, %157 : vector<2x32xf32>
    %173 = arith.mulf %168, %171 : vector<2x32xf32>
    %174 = arith.addf %172, %173 : vector<2x32xf32>
    %175 = math.tanh %174 : vector<2x32xf32>
    %176 = arith.mulf %170, %175 : vector<2x32xf32>
    %cst_38 = arith.constant dense<0.000000e+00> : vector<2x128xf32>
    %177 = tpu.matmul %176, %1, %cst_38 {dimension_numbers = #tpu.dot_dimension_numbers<[1], [0], [0], [1], [0, 0, 1, 1], [], []>} : vector<2x32xf32>, vector<32x128xf32>, vector<2x128xf32> -> vector<2x128xf32>
    %178 = arith.addf %177, %25 : vector<2x128xf32>
    %179 = arith.negf %178 : vector<2x128xf32>
    %180 = math.exp %179 : vector<2x128xf32>
    %cst_39 = arith.constant 1.000000e+00 : f32
    %181 = vector.broadcast %cst_39 : f32 to vector<2x128xf32>
    %182 = arith.addf %181, %180 : vector<2x128xf32>
    %183 = arith.divf %181, %182 : vector<2x128xf32>
    %184 = math.tanh %178 : vector<2x128xf32>
    %185 = vector.extract_strided_slice %183 {offsets = [0, 0], sizes = [2, 32], strides = [1, 1]} : vector<2x128xf32> to vector<2x32xf32>
    %186 = vector.extract_strided_slice %183 {offsets = [0, 32], sizes = [2, 32], strides = [1, 1]} : vector<2x128xf32> to vector<2x32xf32>
    %187 = vector.extract_strided_slice %183 {offsets = [0, 64], sizes = [2, 32], strides = [1, 1]} : vector<2x128xf32> to vector<2x32xf32>
    %188 = vector.extract_strided_slice %184 {offsets = [0, 96], sizes = [2, 32], strides = [1, 1]} : vector<2x128xf32> to vector<2x32xf32>
    %189 = arith.mulf %186, %174 : vector<2x32xf32>
    %190 = arith.mulf %185, %188 : vector<2x32xf32>
    %191 = arith.addf %189, %190 : vector<2x32xf32>
    %192 = math.tanh %191 : vector<2x32xf32>
    %193 = arith.mulf %187, %192 : vector<2x32xf32>
    %cst_40 = arith.constant dense<0.000000e+00> : vector<2x128xf32>
    %194 = tpu.matmul %193, %2, %cst_40 {dimension_numbers = #tpu.dot_dimension_numbers<[1], [0], [0], [1], [0, 0, 1, 1], [], []>} : vector<2x32xf32>, vector<32x128xf32>, vector<2x128xf32> -> vector<2x128xf32>
    %195 = arith.addf %194, %26 : vector<2x128xf32>
    %196 = arith.negf %195 : vector<2x128xf32>
    %197 = math.exp %196 : vector<2x128xf32>
    %cst_41 = arith.constant 1.000000e+00 : f32
    %198 = vector.broadcast %cst_41 : f32 to vector<2x128xf32>
    %199 = arith.addf %198, %197 : vector<2x128xf32>
    %200 = arith.divf %198, %199 : vector<2x128xf32>
    %201 = math.tanh %195 : vector<2x128xf32>
    %202 = vector.extract_strided_slice %200 {offsets = [0, 0], sizes = [2, 32], strides = [1, 1]} : vector<2x128xf32> to vector<2x32xf32>
    %203 = vector.extract_strided_slice %200 {offsets = [0, 32], sizes = [2, 32], strides = [1, 1]} : vector<2x128xf32> to vector<2x32xf32>
    %204 = vector.extract_strided_slice %200 {offsets = [0, 64], sizes = [2, 32], strides = [1, 1]} : vector<2x128xf32> to vector<2x32xf32>
    %205 = vector.extract_strided_slice %201 {offsets = [0, 96], sizes = [2, 32], strides = [1, 1]} : vector<2x128xf32> to vector<2x32xf32>
    %206 = arith.mulf %203, %191 : vector<2x32xf32>
    %207 = arith.mulf %202, %205 : vector<2x32xf32>
    %208 = arith.addf %206, %207 : vector<2x32xf32>
    %209 = math.tanh %208 : vector<2x32xf32>
    %210 = arith.mulf %204, %209 : vector<2x32xf32>
    %cst_42 = arith.constant dense<0.000000e+00> : vector<2x128xf32>
    %211 = tpu.matmul %210, %2, %cst_42 {dimension_numbers = #tpu.dot_dimension_numbers<[1], [0], [0], [1], [0, 0, 1, 1], [], []>} : vector<2x32xf32>, vector<32x128xf32>, vector<2x128xf32> -> vector<2x128xf32>
    %212 = arith.addf %211, %27 : vector<2x128xf32>
    %213 = arith.negf %212 : vector<2x128xf32>
    %214 = math.exp %213 : vector<2x128xf32>
    %cst_43 = arith.constant 1.000000e+00 : f32
    %215 = vector.broadcast %cst_43 : f32 to vector<2x128xf32>
    %216 = arith.addf %215, %214 : vector<2x128xf32>
    %217 = arith.divf %215, %216 : vector<2x128xf32>
    %218 = math.tanh %212 : vector<2x128xf32>
    %219 = vector.extract_strided_slice %217 {offsets = [0, 0], sizes = [2, 32], strides = [1, 1]} : vector<2x128xf32> to vector<2x32xf32>
    %220 = vector.extract_strided_slice %217 {offsets = [0, 32], sizes = [2, 32], strides = [1, 1]} : vector<2x128xf32> to vector<2x32xf32>
    %221 = vector.extract_strided_slice %217 {offsets = [0, 64], sizes = [2, 32], strides = [1, 1]} : vector<2x128xf32> to vector<2x32xf32>
    %222 = vector.extract_strided_slice %218 {offsets = [0, 96], sizes = [2, 32], strides = [1, 1]} : vector<2x128xf32> to vector<2x32xf32>
    %223 = arith.mulf %220, %208 : vector<2x32xf32>
    %224 = arith.mulf %219, %222 : vector<2x32xf32>
    %225 = arith.addf %223, %224 : vector<2x32xf32>
    %226 = math.tanh %225 : vector<2x32xf32>
    %227 = arith.mulf %221, %226 : vector<2x32xf32>
    %cst_44 = arith.constant dense<0.000000e+00> : vector<2x128xf32>
    %228 = tpu.matmul %227, %2, %cst_44 {dimension_numbers = #tpu.dot_dimension_numbers<[1], [0], [0], [1], [0, 0, 1, 1], [], []>} : vector<2x32xf32>, vector<32x128xf32>, vector<2x128xf32> -> vector<2x128xf32>
    %229 = arith.addf %228, %28 : vector<2x128xf32>
    %230 = arith.negf %229 : vector<2x128xf32>
    %231 = math.exp %230 : vector<2x128xf32>
    %cst_45 = arith.constant 1.000000e+00 : f32
    %232 = vector.broadcast %cst_45 : f32 to vector<2x128xf32>
    %233 = arith.addf %232, %231 : vector<2x128xf32>
    %234 = arith.divf %232, %233 : vector<2x128xf32>
    %235 = math.tanh %229 : vector<2x128xf32>
    %236 = vector.extract_strided_slice %234 {offsets = [0, 0], sizes = [2, 32], strides = [1, 1]} : vector<2x128xf32> to vector<2x32xf32>
    %237 = vector.extract_strided_slice %234 {offsets = [0, 32], sizes = [2, 32], strides = [1, 1]} : vector<2x128xf32> to vector<2x32xf32>
    %238 = vector.extract_strided_slice %234 {offsets = [0, 64], sizes = [2, 32], strides = [1, 1]} : vector<2x128xf32> to vector<2x32xf32>
    %239 = vector.extract_strided_slice %235 {offsets = [0, 96], sizes = [2, 32], strides = [1, 1]} : vector<2x128xf32> to vector<2x32xf32>
    %240 = arith.mulf %237, %225 : vector<2x32xf32>
    %241 = arith.mulf %236, %239 : vector<2x32xf32>
    %242 = arith.addf %240, %241 : vector<2x32xf32>
    %243 = math.tanh %242 : vector<2x32xf32>
    %244 = arith.mulf %238, %243 : vector<2x32xf32>
    %cst_46 = arith.constant dense<0.000000e+00> : vector<2x128xf32>
    %245 = tpu.matmul %244, %2, %cst_46 {dimension_numbers = #tpu.dot_dimension_numbers<[1], [0], [0], [1], [0, 0, 1, 1], [], []>} : vector<2x32xf32>, vector<32x128xf32>, vector<2x128xf32> -> vector<2x128xf32>
    %246 = arith.addf %245, %29 : vector<2x128xf32>
    %247 = arith.negf %246 : vector<2x128xf32>
    %248 = math.exp %247 : vector<2x128xf32>
    %cst_47 = arith.constant 1.000000e+00 : f32
    %249 = vector.broadcast %cst_47 : f32 to vector<2x128xf32>
    %250 = arith.addf %249, %248 : vector<2x128xf32>
    %251 = arith.divf %249, %250 : vector<2x128xf32>
    %252 = math.tanh %246 : vector<2x128xf32>
    %253 = vector.extract_strided_slice %251 {offsets = [0, 0], sizes = [2, 32], strides = [1, 1]} : vector<2x128xf32> to vector<2x32xf32>
    %254 = vector.extract_strided_slice %251 {offsets = [0, 32], sizes = [2, 32], strides = [1, 1]} : vector<2x128xf32> to vector<2x32xf32>
    %255 = vector.extract_strided_slice %251 {offsets = [0, 64], sizes = [2, 32], strides = [1, 1]} : vector<2x128xf32> to vector<2x32xf32>
    %256 = vector.extract_strided_slice %252 {offsets = [0, 96], sizes = [2, 32], strides = [1, 1]} : vector<2x128xf32> to vector<2x32xf32>
    %257 = arith.mulf %254, %242 : vector<2x32xf32>
    %258 = arith.mulf %253, %256 : vector<2x32xf32>
    %259 = arith.addf %257, %258 : vector<2x32xf32>
    %260 = math.tanh %259 : vector<2x32xf32>
    %261 = arith.mulf %255, %260 : vector<2x32xf32>
    %cst_48 = arith.constant dense<0.000000e+00> : vector<2x128xf32>
    %262 = tpu.matmul %261, %2, %cst_48 {dimension_numbers = #tpu.dot_dimension_numbers<[1], [0], [0], [1], [0, 0, 1, 1], [], []>} : vector<2x32xf32>, vector<32x128xf32>, vector<2x128xf32> -> vector<2x128xf32>
    %263 = arith.addf %262, %30 : vector<2x128xf32>
    %264 = arith.negf %263 : vector<2x128xf32>
    %265 = math.exp %264 : vector<2x128xf32>
    %cst_49 = arith.constant 1.000000e+00 : f32
    %266 = vector.broadcast %cst_49 : f32 to vector<2x128xf32>
    %267 = arith.addf %266, %265 : vector<2x128xf32>
    %268 = arith.divf %266, %267 : vector<2x128xf32>
    %269 = math.tanh %263 : vector<2x128xf32>
    %270 = vector.extract_strided_slice %268 {offsets = [0, 0], sizes = [2, 32], strides = [1, 1]} : vector<2x128xf32> to vector<2x32xf32>
    %271 = vector.extract_strided_slice %268 {offsets = [0, 32], sizes = [2, 32], strides = [1, 1]} : vector<2x128xf32> to vector<2x32xf32>
    %272 = vector.extract_strided_slice %268 {offsets = [0, 64], sizes = [2, 32], strides = [1, 1]} : vector<2x128xf32> to vector<2x32xf32>
    %273 = vector.extract_strided_slice %269 {offsets = [0, 96], sizes = [2, 32], strides = [1, 1]} : vector<2x128xf32> to vector<2x32xf32>
    %274 = arith.mulf %271, %259 : vector<2x32xf32>
    %275 = arith.mulf %270, %273 : vector<2x32xf32>
    %276 = arith.addf %274, %275 : vector<2x32xf32>
    %277 = math.tanh %276 : vector<2x32xf32>
    %278 = arith.mulf %272, %277 : vector<2x32xf32>
    %cst_50 = arith.constant dense<0.000000e+00> : vector<2x128xf32>
    %279 = tpu.matmul %278, %2, %cst_50 {dimension_numbers = #tpu.dot_dimension_numbers<[1], [0], [0], [1], [0, 0, 1, 1], [], []>} : vector<2x32xf32>, vector<32x128xf32>, vector<2x128xf32> -> vector<2x128xf32>
    %280 = arith.addf %279, %31 : vector<2x128xf32>
    %281 = arith.negf %280 : vector<2x128xf32>
    %282 = math.exp %281 : vector<2x128xf32>
    %cst_51 = arith.constant 1.000000e+00 : f32
    %283 = vector.broadcast %cst_51 : f32 to vector<2x128xf32>
    %284 = arith.addf %283, %282 : vector<2x128xf32>
    %285 = arith.divf %283, %284 : vector<2x128xf32>
    %286 = math.tanh %280 : vector<2x128xf32>
    %287 = vector.extract_strided_slice %285 {offsets = [0, 0], sizes = [2, 32], strides = [1, 1]} : vector<2x128xf32> to vector<2x32xf32>
    %288 = vector.extract_strided_slice %285 {offsets = [0, 32], sizes = [2, 32], strides = [1, 1]} : vector<2x128xf32> to vector<2x32xf32>
    %289 = vector.extract_strided_slice %285 {offsets = [0, 64], sizes = [2, 32], strides = [1, 1]} : vector<2x128xf32> to vector<2x32xf32>
    %290 = vector.extract_strided_slice %286 {offsets = [0, 96], sizes = [2, 32], strides = [1, 1]} : vector<2x128xf32> to vector<2x32xf32>
    %291 = arith.mulf %288, %276 : vector<2x32xf32>
    %292 = arith.mulf %287, %290 : vector<2x32xf32>
    %293 = arith.addf %291, %292 : vector<2x32xf32>
    %294 = math.tanh %293 : vector<2x32xf32>
    %295 = arith.mulf %289, %294 : vector<2x32xf32>
    %cst_52 = arith.constant dense<0.000000e+00> : vector<2x128xf32>
    %296 = tpu.matmul %295, %2, %cst_52 {dimension_numbers = #tpu.dot_dimension_numbers<[1], [0], [0], [1], [0, 0, 1, 1], [], []>} : vector<2x32xf32>, vector<32x128xf32>, vector<2x128xf32> -> vector<2x128xf32>
    %297 = arith.addf %296, %32 : vector<2x128xf32>
    %298 = arith.negf %297 : vector<2x128xf32>
    %299 = math.exp %298 : vector<2x128xf32>
    %cst_53 = arith.constant 1.000000e+00 : f32
    %300 = vector.broadcast %cst_53 : f32 to vector<2x128xf32>
    %301 = arith.addf %300, %299 : vector<2x128xf32>
    %302 = arith.divf %300, %301 : vector<2x128xf32>
    %303 = math.tanh %297 : vector<2x128xf32>
    %304 = vector.extract_strided_slice %302 {offsets = [0, 0], sizes = [2, 32], strides = [1, 1]} : vector<2x128xf32> to vector<2x32xf32>
    %305 = vector.extract_strided_slice %302 {offsets = [0, 32], sizes = [2, 32], strides = [1, 1]} : vector<2x128xf32> to vector<2x32xf32>
    %306 = vector.extract_strided_slice %302 {offsets = [0, 64], sizes = [2, 32], strides = [1, 1]} : vector<2x128xf32> to vector<2x32xf32>
    %307 = vector.extract_strided_slice %303 {offsets = [0, 96], sizes = [2, 32], strides = [1, 1]} : vector<2x128xf32> to vector<2x32xf32>
    %308 = arith.mulf %305, %293 : vector<2x32xf32>
    %309 = arith.mulf %304, %307 : vector<2x32xf32>
    %310 = arith.addf %308, %309 : vector<2x32xf32>
    %311 = math.tanh %310 : vector<2x32xf32>
    %312 = arith.mulf %306, %311 : vector<2x32xf32>
    %cst_54 = arith.constant dense<0.000000e+00> : vector<2x128xf32>
    %313 = tpu.matmul %312, %2, %cst_54 {dimension_numbers = #tpu.dot_dimension_numbers<[1], [0], [0], [1], [0, 0, 1, 1], [], []>} : vector<2x32xf32>, vector<32x128xf32>, vector<2x128xf32> -> vector<2x128xf32>
    %314 = vector.broadcast %33 : vector<1x128xf32> to vector<2x128xf32>
    %315 = arith.addf %313, %314 : vector<2x128xf32>
    %316 = arith.negf %315 : vector<2x128xf32>
    %317 = math.exp %316 : vector<2x128xf32>
    %cst_55 = arith.constant 1.000000e+00 : f32
    %318 = vector.broadcast %cst_55 : f32 to vector<2x128xf32>
    %319 = arith.addf %318, %317 : vector<2x128xf32>
    %320 = arith.divf %318, %319 : vector<2x128xf32>
    %321 = math.tanh %315 : vector<2x128xf32>
    %322 = vector.extract_strided_slice %320 {offsets = [0, 0], sizes = [2, 32], strides = [1, 1]} : vector<2x128xf32> to vector<2x32xf32>
    %323 = vector.extract_strided_slice %320 {offsets = [0, 32], sizes = [2, 32], strides = [1, 1]} : vector<2x128xf32> to vector<2x32xf32>
    %324 = vector.extract_strided_slice %320 {offsets = [0, 64], sizes = [2, 32], strides = [1, 1]} : vector<2x128xf32> to vector<2x32xf32>
    %325 = vector.extract_strided_slice %321 {offsets = [0, 96], sizes = [2, 32], strides = [1, 1]} : vector<2x128xf32> to vector<2x32xf32>
    %326 = arith.mulf %323, %310 : vector<2x32xf32>
    %327 = arith.mulf %322, %325 : vector<2x32xf32>
    %328 = arith.addf %326, %327 : vector<2x32xf32>
    %329 = math.tanh %328 : vector<2x32xf32>
    %330 = arith.mulf %324, %329 : vector<2x32xf32>
    %331 = tpu.concatenate %210, %227, %244, %261, %278, %295, %312, %330 in 0 : vector<2x32xf32>, vector<2x32xf32>, vector<2x32xf32>, vector<2x32xf32>, vector<2x32xf32>, vector<2x32xf32>, vector<2x32xf32>, vector<2x32xf32> -> vector<16x32xf32>
    %c0_56 = arith.constant 0 : index
    %c0_57 = arith.constant 0 : index
    %332 = vector.load %arg11[%c0_56, %c0_57] : memref<32x10xf32, #tpu.memory_space<vmem>>, vector<32x10xf32>
    %cst_58 = arith.constant dense<0.000000e+00> : vector<16x10xf32>
    %333 = tpu.matmul %331, %332, %cst_58 {dimension_numbers = #tpu.dot_dimension_numbers<[1], [0], [0], [1], [0, 0, 1, 1], [], []>} : vector<16x32xf32>, vector<32x10xf32>, vector<16x10xf32> -> vector<16x10xf32>
    %c0_59 = arith.constant 0 : index
    %c0_60 = arith.constant 0 : index
    %334 = vector.load %arg12[%c0_59, %c0_60] : memref<1x10xf32, #tpu.memory_space<vmem>>, vector<1x10xf32>
    %335 = vector.broadcast %334 : vector<1x10xf32> to vector<16x10xf32>
    %336 = arith.addf %333, %335 : vector<16x10xf32>
    %c0_61 = arith.constant 0 : index
    %c0_62 = arith.constant 0 : index
    %337 = vector.load %arg13[%c0_61, %c0_62] : memref<16x10xf32, #tpu.memory_space<vmem>>, vector<16x10xf32>
    tpu.vector_store %arg13[%c0_61, %c0_62], %336 {strides = array<i32>} : memref<16x10xf32, #tpu.memory_space<vmem>>, vector<16x10xf32>,
    return
  }
}

</mosaic_0001>

<bundles_post_ra>
// kernel: tpu_custom_call.1
= control target key start
LH: loop header
LB: loop body
LE: loop exit
PB: predicated region body
PF: predicated region fallthrough
CT: control target
= control target key end

     0   :  { %18 = vsyncpa [#allocation3], 0  ;;  %s2091_s0 = inlined_call_operand.vmem [shape: f32[16,10], index: 0, kind: input, shape index: {}]   ;;  %s2092_s1 = inlined_call_operand.hbm [shape: f32[16,10], index: 1, kind: input, shape index: {}]   ;;  %s2093_s2 = inlined_call_operand.hbm [shape: f32[10,128], index: 2, kind: input, shape index: {}]   ;;  %s2094_s3 = inlined_call_operand.vmem [shape: f32[1,128], index: 3, kind: input, shape index: {}]   ;;  %s2095_s4 = inlined_call_operand.hbm [shape: f32[10,128], index: 4, kind: input, shape index: {}]   ;;  %s2096_s5 = inlined_call_operand.vmem [shape: f32[1,128], index: 5, kind: input, shape index: {}]   ;;  %s2097_s6 = inlined_call_operand.vmem [shape: f32[1,128], index: 6, kind: input, shape index: {}]   ;;  %s2098_s7 = inlined_call_operand.vmem [shape: f32[1,128], index: 7, kind: input, shape index: {}]   ;;  %s2099_s8 = inlined_call_operand.vmem [shape: f32[32,128], index: 8, kind: input, shape index: {}]   ;;  %s2100_s9 = inlined_call_operand.hbm [shape: f32[32,128], index: 9, kind: input, shape index: {}]   ;;  %s2101_s10 = inlined_call_operand.hbm [shape: f32[32,128], index: 10, kind: input, shape index: {}]   ;;  %s2102_s11 = inlined_call_operand.vmem [shape: f32[32,10], index: 11, kind: input, shape index: {}]   ;;  %s2103_s12 = inlined_call_operand.vmem [shape: f32[1,10], index: 12, kind: input, shape index: {}]   ;;  %s2104_s13 = inlined_call_operand.hbm [shape: f32[16,10], index: 13, kind: output, shape index: {}]  }
   0x1   :  { %19 = vsyncpa [#allocation6], 0 }
   0x2   :  { %20 = vsyncpa [#allocation9], 0 }
   0x3   :  { %21 = vsyncpa [#allocation4], 0  ;;  %s41_s27 = sshll.u32 %s2093_s2, 4  ;;  %s1731_s28 = smov [#allocation5]   ;;  %s42_s27 = int_to_ptr.hbm [resolvable:$true] %s41_s27 }
   0x4   :  { %s43_s29 = sshll.u32 %s1731_s28, 4  ;;  %s77_s15 = sshll.u32 %s2100_s9, 4  ;;  %s44_s29 = int_to_ptr.vmem [resolvable:$true] %s43_s29  ;;  %s78_s15 = int_to_ptr.hbm [resolvable:$true] %s77_s15 }
   0x5   :  { %s1732_s16 = smov 128   ;;  %s1733_s17 = smov 8  }
   0x6   :  { %49 = dma.hbm_to_vmem [thread:$0]  %s42_s27, 256, %s44_s29, [#allocation6], %s1732_s16, %s1732_s16, %s1733_s17  }
   0x7   :  { %s1734_s18 = smov [#allocation8]   ;;  %s28_s2 = sshll.u32 %s2092_s1, 4  ;;  %s29_s2 = int_to_ptr.hbm [resolvable:$true] %s28_s2 }
   0x8   :  { %s79_s19 = sshll.u32 %s1734_s18, 4  ;;  %s56_s23 = sshll.u32 %s2095_s4, 4  ;;  %s80_s19 = int_to_ptr.vmem [resolvable:$true] %s79_s19  ;;  %s57_s23 = int_to_ptr.hbm [resolvable:$true] %s56_s23 }
   0x9   :  { %85 = dma.hbm_to_vmem [thread:$0]  %s78_s15, 512, %s80_s19, [#allocation9], %s1732_s16, %s1732_s16, %s1733_s17  }
   0xa   :  { %s1735_s24 = smov [#allocation2]   ;;  %s1736_s26 = smov [#allocation7]  }
   0xb   :  { %s30_s25 = sshll.u32 %s1735_s24, 4  ;;  %s58_s1 = sshll.u32 %s1736_s26, 4  ;;  %s31_s25 = int_to_ptr.vmem [resolvable:$true] %s30_s25  ;;  %s59_s1 = int_to_ptr.vmem [resolvable:$true] %s58_s1 }
   0xc   :  { %36 = dma.hbm_to_vmem [thread:$0]  %s29_s2, 256, %s31_s25, [#allocation3], %s1732_s16, %s1732_s16, %s1733_s17  }
   0xd   :  { %s90_s29 = sshll.u32 %s2101_s10, 4  ;;  %s1737_s4 = smov [#allocation10]   ;;  %s91_s29 = int_to_ptr.hbm [resolvable:$true] %s90_s29 }
   0xe   :  { %64 = dma.hbm_to_vmem [thread:$0]  %s57_s23, 256, %s59_s1, [#allocation6], %s1732_s16, %s1732_s16, %s1733_s17  }
   0xf   :  { %s92_s30 = sshll.u32 %s1737_s4, 4  ;;  %s93_s30 = int_to_ptr.vmem [resolvable:$true] %s92_s30 }
  0x10   :  { %98 = dma.hbm_to_vmem [thread:$0]  %s91_s29, 512, %s93_s30, [#allocation9], %s1732_s16, %s1732_s16, %s1733_s17  }
  0x11   :  { %1723 = dma.done.wait [#allocation3], 256  }
  0x12   :  { %1724 = vsyncadd [#allocation3], 4294967040 }
  0x13   :  { %1725 = dma.done.wait [#allocation6], 512  }
  0x14   :  { %1726 = vsyncadd [#allocation6], 4294966784 }
  0x15   :  { %1727 = dma.done.wait [#allocation9], 1024  }
  0x16   :  { %1728 = vsyncadd [#allocation9], 4294966272  ;;  %vm150_vm0 = vcmask 1041408   ;;  %v138_v0 = vld [vmem:[#allocation5 + $0x8] sm:$0x3]  ;;  %v137_v1 = vld [vmem:[#allocation5] sm:$0xff]  ;;  %v223_v18 = vlaneseq }
  0x17   :  { %1383 = vmatpush.msk.msra.mxu0 %vm150_vm0, %v138_v0  ;;  %v135_v2 = vld [vmem:[%s2091_s0] sm:$0xff]  ;;  %vm143_vm1 = vcmask 80896   ;;  %1425 = vmatpush.msk.msra.mxu1 %vm150_vm0, %v138_v0  ;;  %s1738_s19 = smov 32   ;;  %v1739_v24 = vmov 0.0   ;;  %v1869_v30 = vld [vmem:[%s2099_s8 + $0x18] sm:$0xff]  ;;  %v1874_v31 = vld [vmem:[%s2099_s8 + $0x10] sm:$0xff] }
  0x18   :  { %v1851_v3 = vld [vmem:[%s2094_s3] ss:$0 sm:$0xff]  ;;  %v224_v23 = vand.u32 127, %v223_v18  ;;  %s1740_s3 = smov 64   ;;  %295 = vmatpush.msra.mxu2 %v1869_v30  ;;  %359 = vmatpush.msra.mxu3 %v1869_v30  ;;  %v1881_v32 = vld [vmem:[%s2099_s8 + $0x8] sm:$0xff]  ;;  %vm280_vm7 = vcmask 261120  }
  0x19   :  { %169 = vmatpush.msra.mxu0 %v137_v1  ;;  %1426 = vmatpush.msra.mxu1 %v137_v1  ;;  %v1894_v37 = vld [vmem:[%s2099_s8] sm:$0xff]  ;;  %s1741_s21 = smov [#allocation11]  }
  0x1a   :  { %1384 = vmatmul.msk.f32.vlgmr.msra.gmra.mxu0 %vm143_vm1, %v135_v2  ;;  %vm225_vm6 = vcmp.ge.s32.totalorder %v224_v23, 16  ;;  %296 = vmatpush.msra.mxu2 %v1874_v31 }
  0x1b   :  { %v1389_v25 = vsel %vm225_vm6, 1.0, %v1739_v24  ;;  %550 = vmatpush.msrb.mxu0 %v1869_v30  ;;  %360 = vmatpush.msra.mxu3 %v1874_v31 }
  0x1c   :  { %297 = vmatpush.msra.mxu2 %v1881_v32 }
  0x1d   :  { %551 = vmatpush.msrb.mxu0 %v1874_v31  ;;  %361 = vmatpush.msra.mxu3 %v1881_v32 }
  0x1e   :  { %298 = vmatpush.msra.mxu2 %v1894_v37 }
  0x1f   :  { %552 = vmatpush.msrb.mxu0 %v1881_v32  ;;  %362 = vmatpush.msra.mxu3 %v1894_v37 }
  0x20   :  { %423 = vmatpush.msrb.mxu2 %v1869_v30 }
  0x21   :  { %485 = vmatpush.msrb.mxu3 %v1869_v30  ;;  %553 = vmatpush.msrb.mxu0 %v1894_v37 }
  0x22   :  { %424 = vmatpush.msrb.mxu2 %v1874_v31 }
  0x23   :  { %486 = vmatpush.msrb.mxu3 %v1874_v31 }
  0x24   :  { %425 = vmatpush.msrb.mxu2 %v1881_v32 }
  0x25   :  { %487 = vmatpush.msrb.mxu3 %v1881_v32 }
  0x26   :  { %426 = vmatpush.msrb.mxu2 %v1894_v37 }
  0x27   :  { %488 = vmatpush.msrb.mxu3 %v1894_v37 }
  0x97   :  { %v171_v4 = vpop.f32.mrf.mxu0 }
  0x98   :  { %v1854_v5 = vadd.f32 %v1851_v3, %v171_v4 }
  0x9a   :  { %1443 = vtanh.f32 %v1854_v5  ;;  %v1390_v7 = vmul.f32 -1.442695, %v1854_v5  ;;  %v278_v39 = vrot.slane %v1854_v5, 2  ;;  %v343_v4 = vrot.slane %v1854_v5, 4 }
  0x9c   :  { %1445 = vpow2.f32 %v1390_v7 }
  0xa0   :  { %v1444_v6 = vpop.eup %1443 }
  0xa1   :  { %250 = vrot.lane.b32.xlu0 %v1444_v6, %s1738_s19 }
  0xa2   :  { %v1446_v8 = vpop.eup %1445 }
  0xa3   :  { %v231_v9 = vadd.f32 1.0, %v1446_v8 }
  0xa5   :  { %1447 = vrcp.f32 %v231_v9  ;;  %v243_v15 = vand.u32 2147483648, %v231_v9  ;;  %vm237_vm3 = vweird.f32 %v231_v9  ;;  %v241_v16 = vand.u32 2147483647, %v231_v9 }
  0xa7   :  { %v244_v19 = vor.u32 1.1754944e-38, %v243_v15  ;;  %vm242_vm5 = vcmp.eq.f32.partialorder %v241_v16, 8.507059e+37 }
  0xab   :  { %v1448_v10 = vpop.eup %1447 }
  0xac   :  { %v233_v11 = vmul.f32 %v1448_v10, %v231_v9  ;;  %vm238_vm2 = vweird.f32 %v1448_v10 }
  0xad   :  { %vm239_vm4 = vmor %vm237_vm3, %vm238_vm2 }
  0xae   :  { %v234_v12 = vsub.f32 1.0, %v233_v11 }
  0xb0   :  { %v235_v13 = vmul.f32 %v1448_v10, %v234_v12 }
  0xb2   :  { %v236_v14 = vadd.f32 %v1448_v10, %v235_v13 }
  0xb4   :  { %v240_v17 = vsel %vm239_vm4, %v1448_v10, %v236_v14 }
  0xb5   :  { %v245_v21 = vsel %vm242_vm5, %v244_v19, %v240_v17 }
  0xb6   :  { %v248_v26 = vmul.f32 0.0, %v245_v21 }
 0x113   :  { %v251_v20 = vpop.permute.xlu0 %250 }
 0x114   :  { %v253_v22 = vmul.f32 %v251_v20, %v245_v21 }
 0x116   :  { %255 = vrot.lane.b32.xlu0 %v253_v22, %s1738_s19 }
 0x11e   :  { %270 = vrot.lane.b32.xlu0 %v1389_v25, %s1738_s19 }
 0x188   :  { %v256_v27 = vpop.permute.xlu0 %255 }
 0x189   :  { %v1861_v28 = vadd.f32 %v256_v27, %v248_v26 }
 0x18b   :  { %1449 = vtanh.f32 %v1861_v28 }
 0x190   :  { %v271_v58 = vpop.permute.xlu0 %270 }
 0x191   :  { %v1450_v29 = vpop.eup %1449  ;;  %v273_v59 = vmul.f32 %v271_v58, %v1861_v28 }
 0x192   :  { %261 = vrot.lane.b32.xlu1 %v1450_v29, %s1738_s19 }
 0x19a   :  { %266 = vrot.lane.b32.xlu1 %v1389_v25, %s1740_s3 }
 0x204   :  { %v262_v33 = vpop.permute.xlu1 %261 }
 0x205   :  { %v264_v34 = vmul.f32 %v262_v33, %v245_v21 }
 0x20c   :  { %v267_v35 = vpop.permute.xlu1 %266 }
 0x20d   :  { %v269_v36 = vmul.f32 %v267_v35, %v264_v34  ;;  %v407_v34 = vrot.slane %v1854_v5, 6 }
 0x20f   :  { %275 = vrot.lane.b32.xlu2 %v269_v36, %s1740_s3 }
 0x269   :  { %v276_v38 = vpop.permute.xlu2 %275 }
 0x26a   :  { %1391 = vmatmul.msk.f32.vlgmr.msra.gmra.mxu2 %vm280_vm7, %v276_v38 }
 0x26b   :  { %678 = vmatpush.msra.mxu2 %v1869_v30 }
 0x26d   :  { %679 = vmatpush.msra.mxu2 %v1874_v31 }
 0x26f   :  { %680 = vmatpush.msra.mxu2 %v1881_v32 }
 0x271   :  { %681 = vmatpush.msra.mxu2 %v1894_v37 }
 0x2ed   :  { %v300_v40 = vpop.f32.mrf.mxu2 }
 0x2ee   :  { %v301_v41 = vadd.f32 %v300_v40, %v278_v39 }
 0x2f0   :  { %1451 = vtanh.f32 %v301_v41  ;;  %v1392_v43 = vmul.f32 -1.442695, %v301_v41 }
 0x2f2   :  { %1453 = vpow2.f32 %v1392_v43 }
 0x2f6   :  { %v1452_v42 = vpop.eup %1451 }
 0x2f7   :  { %325 = vrot.lane.b32.xlu2 %v1452_v42, %s1738_s19 }
 0x2f8   :  { %v1454_v44 = vpop.eup %1453 }
 0x2f9   :  { %v306_v45 = vadd.f32 1.0, %v1454_v44 }
 0x2fb   :  { %1455 = vrcp.f32 %v306_v45  ;;  %v318_v51 = vand.u32 2147483648, %v306_v45  ;;  %vm312_vm9 = vweird.f32 %v306_v45  ;;  %v316_v52 = vand.u32 2147483647, %v306_v45 }
 0x2fd   :  { %v319_v54 = vor.u32 1.1754944e-38, %v318_v51  ;;  %vm317_vm11 = vcmp.eq.f32.partialorder %v316_v52, 8.507059e+37 }
 0x301   :  { %v1456_v46 = vpop.eup %1455 }
 0x302   :  { %v308_v47 = vmul.f32 %v1456_v46, %v306_v45  ;;  %vm313_vm8 = vweird.f32 %v1456_v46 }
 0x303   :  { %vm314_vm10 = vmor %vm312_vm9, %vm313_vm8 }
 0x304   :  { %v309_v48 = vsub.f32 1.0, %v308_v47 }
 0x306   :  { %v310_v49 = vmul.f32 %v1456_v46, %v309_v48 }
 0x308   :  { %v311_v50 = vadd.f32 %v1456_v46, %v310_v49 }
 0x30a   :  { %v315_v53 = vsel %vm314_vm10, %v1456_v46, %v311_v50 }
 0x30b   :  { %v320_v56 = vsel %vm317_vm11, %v319_v54, %v315_v53 }
 0x30c   :  { %v323_v60 = vmul.f32 %v320_v56, %v273_v59  ;;  %v136_v59 = vld [vmem:[%s2091_s0 + $0x8] sm:$0xff] }
 0x30d   :  { %1385 = vmatmul.msk.f32.vlgmr.msra.gmra.mxu1 %vm143_vm1, %v136_v59 }
 0x351   :  { %v326_v55 = vpop.permute.xlu2 %325 }
 0x352   :  { %v328_v57 = vmul.f32 %v326_v55, %v320_v56 }
 0x354   :  { %330 = vrot.lane.b32.xlu1 %v328_v57, %s1738_s19 }
 0x3c6   :  { %v331_v61 = vpop.permute.xlu1 %330 }
 0x3c7   :  { %v333_v62 = vadd.f32 %v331_v61, %v323_v60  ;;  %v174_v61 = vpop.f32.mrf.mxu1 }
 0x3c9   :  { %1457 = vtanh.f32 %v333_v62 }
 0x3cf   :  { %v1458_v63 = vpop.eup %1457 }
 0x3d0   :  { %336 = vrot.lane.b32.xlu2 %v1458_v63, %s1738_s19 }
 0x42a   :  { %v337_v0 = vpop.permute.xlu2 %336 }
 0x42b   :  { %v339_v1 = vmul.f32 %v337_v0, %v320_v56 }
 0x42d   :  { %341 = vrot.lane.b32.xlu0 %v339_v1, %s1740_s3 }
 0x49f   :  { %v342_v2 = vpop.permute.xlu0 %341 }
 0x4a0   :  { %1393 = vmatmul.msk.f32.vlgmr.msra.gmra.mxu3 %vm280_vm7, %v342_v2 }
 0x523   :  { %v364_v6 = vpop.f32.mrf.mxu3 }
 0x524   :  { %v365_v7 = vadd.f32 %v364_v6, %v343_v4 }
 0x526   :  { %1459 = vtanh.f32 %v365_v7  ;;  %v1394_v9 = vmul.f32 -1.442695, %v365_v7 }
 0x528   :  { %1461 = vpow2.f32 %v1394_v9 }
 0x52c   :  { %v1460_v8 = vpop.eup %1459 }
 0x52d   :  { %389 = vrot.lane.b32.xlu1 %v1460_v8, %s1738_s19 }
 0x52e   :  { %v1462_v10 = vpop.eup %1461 }
 0x52f   :  { %v370_v11 = vadd.f32 1.0, %v1462_v10 }
 0x531   :  { %1463 = vrcp.f32 %v370_v11  ;;  %v382_v17 = vand.u32 2147483648, %v370_v11  ;;  %vm376_vm13 = vweird.f32 %v370_v11  ;;  %v380_v18 = vand.u32 2147483647, %v370_v11 }
 0x533   :  { %v383_v20 = vor.u32 1.1754944e-38, %v382_v17  ;;  %vm381_vm15 = vcmp.eq.f32.partialorder %v380_v18, 8.507059e+37 }
 0x537   :  { %v1464_v12 = vpop.eup %1463 }
 0x538   :  { %v372_v13 = vmul.f32 %v1464_v12, %v370_v11  ;;  %vm377_vm12 = vweird.f32 %v1464_v12 }
 0x539   :  { %vm378_vm14 = vmor %vm376_vm13, %vm377_vm12 }
 0x53a   :  { %v373_v14 = vsub.f32 1.0, %v372_v13 }
 0x53c   :  { %v374_v15 = vmul.f32 %v1464_v12, %v373_v14 }
 0x53e   :  { %v375_v16 = vadd.f32 %v1464_v12, %v374_v15 }
 0x540   :  { %v379_v19 = vsel %vm378_vm14, %v1464_v12, %v375_v16 }
 0x541   :  { %v384_v22 = vsel %vm381_vm15, %v383_v20, %v379_v19 }
 0x542   :  { %v387_v24 = vmul.f32 %v384_v22, %v333_v62  ;;  %v1936_v62 = vadd.f32 %v1851_v3, %v174_v61 }
 0x59f   :  { %v390_v21 = vpop.permute.xlu1 %389 }
 0x5a0   :  { %v392_v23 = vmul.f32 %v390_v21, %v384_v22 }
 0x5a2   :  { %394 = vrot.lane.b32.xlu2 %v392_v23, %s1738_s19 }
 0x5fc   :  { %v395_v25 = vpop.permute.xlu2 %394 }
 0x5fd   :  { %v397_v26 = vadd.f32 %v395_v25, %v387_v24  ;;  %v534_v25 = vrot.slane %v1936_v62, 2 }
 0x5ff   :  { %1465 = vtanh.f32 %v397_v26 }
 0x605   :  { %v1466_v27 = vpop.eup %1465 }
 0x606   :  { %400 = vrot.lane.b32.xlu0 %v1466_v27, %s1738_s19 }
 0x678   :  { %v401_v28 = vpop.permute.xlu0 %400 }
 0x679   :  { %v403_v29 = vmul.f32 %v401_v28, %v384_v22 }
 0x67b   :  { %405 = vrot.lane.b32.xlu1 %v403_v29, %s1740_s3 }
 0x6ed   :  { %v406_v33 = vpop.permute.xlu1 %405 }
 0x6ee   :  { %1395 = vmatmul.msk.f32.vlgmr.msrb.gmra.mxu2 %vm280_vm7, %v406_v33 }
 0x771   :  { %v428_v35 = vpop.f32.mrf.mxu2 }
 0x772   :  { %v429_v36 = vadd.f32 %v428_v35, %v407_v34 }
 0x774   :  { %1467 = vtanh.f32 %v429_v36  ;;  %v1396_v39 = vmul.f32 -1.442695, %v429_v36 }
 0x776   :  { %1469 = vpow2.f32 %v1396_v39 }
 0x77a   :  { %v1468_v38 = vpop.eup %1467 }
 0x77b   :  { %453 = vrot.lane.b32.xlu2 %v1468_v38, %s1738_s19 }
 0x77c   :  { %v1470_v40 = vpop.eup %1469 }
 0x77d   :  { %v434_v41 = vadd.f32 1.0, %v1470_v40 }
 0x77f   :  { %1471 = vrcp.f32 %v434_v41  ;;  %v446_v47 = vand.u32 2147483648, %v434_v41  ;;  %vm440_vm3 = vweird.f32 %v434_v41  ;;  %v444_v5 = vand.u32 2147483647, %v434_v41 }
 0x781   :  { %v447_v49 = vor.u32 1.1754944e-38, %v446_v47  ;;  %vm445_vm5 = vcmp.eq.f32.partialorder %v444_v5, 8.507059e+37 }
 0x785   :  { %v1472_v42 = vpop.eup %1471 }
 0x786   :  { %v436_v43 = vmul.f32 %v1472_v42, %v434_v41  ;;  %vm441_vm2 = vweird.f32 %v1472_v42 }
 0x787   :  { %vm442_vm4 = vmor %vm440_vm3, %vm441_vm2 }
 0x788   :  { %v437_v44 = vsub.f32 1.0, %v436_v43 }
 0x78a   :  { %v438_v45 = vmul.f32 %v1472_v42, %v437_v44 }
 0x78c   :  { %v439_v46 = vadd.f32 %v1472_v42, %v438_v45 }
 0x78e   :  { %v443_v48 = vsel %vm442_vm4, %v1472_v42, %v439_v46 }
 0x78f   :  { %v448_v51 = vsel %vm445_vm5, %v447_v49, %v443_v48 }
 0x790   :  { %v451_v53 = vmul.f32 %v448_v51, %v397_v26 }
 0x7d5   :  { %v454_v50 = vpop.permute.xlu2 %453 }
 0x7d6   :  { %v456_v52 = vmul.f32 %v454_v50, %v448_v51 }
 0x7d8   :  { %458 = vrot.lane.b32.xlu0 %v456_v52, %s1738_s19  ;;  %v179_v52 = vld [vmem:[#allocation7] sm:$0xff] }
 0x84a   :  { %v459_v54 = vpop.permute.xlu0 %458 }
 0x84b   :  { %v461_v55 = vadd.f32 %v459_v54, %v451_v53  ;;  %v177_v53 = vld [vmem:[#allocation2] sm:$0xff]  ;;  %v178_v54 = vld [vmem:[#allocation2 + $0x8] sm:$0xff] }
 0x84d   :  { %1473 = vtanh.f32 %v461_v55 }
 0x853   :  { %v1474_v56 = vpop.eup %1473 }
 0x854   :  { %464 = vrot.lane.b32.xlu1 %v1474_v56, %s1738_s19 }
 0x8c6   :  { %v465_v57 = vpop.permute.xlu1 %464 }
 0x8c7   :  { %v467_v58 = vmul.f32 %v465_v57, %v448_v51  ;;  %v180_v51 = vld [vmem:[#allocation7 + $0x8] sm:$0x3] }
 0x8c8   :  { %1386 = vmatpush.msk.msrb.mxu1 %vm150_vm0, %v180_v51 }
 0x8c9   :  { %469 = vrot.lane.b32.xlu2 %v467_v58, %s1740_s3 }
 0x8ca   :  { %209 = vmatpush.msrb.mxu1 %v179_v52  ;;  %v1976_v52 = vld [vmem:[%s2096_s5] ss:$0 sm:$0xff] }
 0x8cb   :  { %1387 = vmatmul.msk.f32.vlgmr.msrb.gmra.mxu1 %vm143_vm1, %v177_v53 }
 0x8cc   :  { %614 = vmatpush.msra.mxu1 %v1869_v30  ;;  %v598_v30 = vrot.slane %v1936_v62, 4 }
 0x8ce   :  { %615 = vmatpush.msra.mxu1 %v1874_v31 }
 0x8d0   :  { %616 = vmatpush.msra.mxu1 %v1881_v32 }
 0x8d2   :  { %617 = vmatpush.msra.mxu1 %v1894_v37 }
 0x8d3   :  { %1388 = vmatmul.msk.f32.gmra.mxu1 %vm143_vm1, %v178_v54  ;;  %v1440_v54 = vld [vmem:[%s2097_s6] ss:$0 sm:$0xff] }
 0x923   :  { %v470_v60 = vpop.permute.xlu2 %469 }
 0x924   :  { %1397 = vmatmul.msk.f32.vlgmr.msrb.gmra.mxu3 %vm280_vm7, %v470_v60 }
 0x948   :  { %v1957_v58 = vpop.f32.mrf.mxu1 }
 0x949   :  { %v1980_v53 = vadd.f32 %v1976_v52, %v1957_v58 }
 0x950   :  { %v1959_v59 = vpop.f32.mrf.mxu1 }
 0x9a7   :  { %v490_v63 = vpop.f32.mrf.mxu3 }
 0x9a8   :  { %v491_v0 = vadd.f32 %v490_v63, %v1936_v62 }
 0x9aa   :  { %1475 = vtanh.f32 %v491_v0  ;;  %v1398_v2 = vmul.f32 -1.442695, %v491_v0 }
 0x9ac   :  { %1477 = vpow2.f32 %v1398_v2 }
 0x9b0   :  { %v1476_v1 = vpop.eup %1475 }
 0x9b1   :  { %515 = vrot.lane.b32.xlu0 %v1476_v1, %s1738_s19 }
 0x9b2   :  { %v1478_v4 = vpop.eup %1477 }
 0x9b3   :  { %v496_v6 = vadd.f32 1.0, %v1478_v4 }
 0x9b5   :  { %1479 = vrcp.f32 %v496_v6  ;;  %v508_v3 = vand.u32 2147483648, %v496_v6  ;;  %vm502_vm8 = vweird.f32 %v496_v6  ;;  %v506_v12 = vand.u32 2147483647, %v496_v6 }
 0x9b7   :  { %v509_v14 = vor.u32 1.1754944e-38, %v508_v3  ;;  %vm507_vm10 = vcmp.eq.f32.partialorder %v506_v12, 8.507059e+37 }
 0x9bb   :  { %v1480_v7 = vpop.eup %1479 }
 0x9bc   :  { %v498_v8 = vmul.f32 %v1480_v7, %v496_v6  ;;  %vm503_vm6 = vweird.f32 %v1480_v7 }
 0x9bd   :  { %vm504_vm9 = vmor %vm502_vm8, %vm503_vm6 }
 0x9be   :  { %v499_v9 = vsub.f32 1.0, %v498_v8 }
 0x9c0   :  { %v500_v10 = vmul.f32 %v1480_v7, %v499_v9 }
 0x9c2   :  { %v501_v11 = vadd.f32 %v1480_v7, %v500_v10 }
 0x9c4   :  { %v505_v13 = vsel %vm504_vm9, %v1480_v7, %v501_v11 }
 0x9c5   :  { %v510_v16 = vsel %vm507_vm10, %v509_v14, %v505_v13 }
 0x9c6   :  { %v513_v18 = vmul.f32 %v510_v16, %v461_v55 }
 0xa23   :  { %v516_v15 = vpop.permute.xlu0 %515 }
 0xa24   :  { %v518_v17 = vmul.f32 %v516_v15, %v510_v16 }
 0xa26   :  { %520 = vrot.lane.b32.xlu1 %v518_v17, %s1738_s19 }
 0xa98   :  { %v521_v19 = vpop.permute.xlu1 %520 }
 0xa99   :  { %v523_v20 = vadd.f32 %v521_v19, %v513_v18 }
 0xa9b   :  { %1481 = vtanh.f32 %v523_v20 }
 0xaa1   :  { %v1482_v21 = vpop.eup %1481 }
 0xaa2   :  { %526 = vrot.lane.b32.xlu2 %v1482_v21, %s1738_s19 }
 0xafc   :  { %v527_v22 = vpop.permute.xlu2 %526 }
 0xafd   :  { %v529_v23 = vmul.f32 %v527_v22, %v510_v16 }
 0xaff   :  { %531 = vrot.lane.b32.xlu0 %v529_v23, %s1740_s3 }
 0xb71   :  { %v532_v24 = vpop.permute.xlu0 %531 }
 0xb72   :  { %1399 = vmatmul.msk.f32.vlgmr.msrb.gmra.mxu0 %vm280_vm7, %v532_v24 }
 0xbef   :  { %v555_v26 = vpop.f32.mrf.mxu0 }
 0xbf0   :  { %v556_v27 = vadd.f32 %v555_v26, %v534_v25 }
 0xbf2   :  { %1483 = vtanh.f32 %v556_v27  ;;  %v1400_v29 = vmul.f32 -1.442695, %v556_v27 }
 0xbf4   :  { %1485 = vpow2.f32 %v1400_v29 }
 0xbf8   :  { %v1484_v28 = vpop.eup %1483 }
 0xbf9   :  { %580 = vrot.lane.b32.xlu1 %v1484_v28, %s1738_s19 }
 0xbfa   :  { %v1486_v33 = vpop.eup %1485 }
 0xbfb   :  { %v561_v34 = vadd.f32 1.0, %v1486_v33 }
 0xbfd   :  { %1487 = vrcp.f32 %v561_v34  ;;  %v573_v41 = vand.u32 2147483648, %v561_v34  ;;  %vm567_vm12 = vweird.f32 %v561_v34  ;;  %v571_v42 = vand.u32 2147483647, %v561_v34 }
 0xbff   :  { %v574_v44 = vor.u32 1.1754944e-38, %v573_v41  ;;  %vm572_vm14 = vcmp.eq.f32.partialorder %v571_v42, 8.507059e+37 }
 0xc03   :  { %v1488_v35 = vpop.eup %1487 }
 0xc04   :  { %v563_v36 = vmul.f32 %v1488_v35, %v561_v34  ;;  %vm568_vm11 = vweird.f32 %v1488_v35 }
 0xc05   :  { %vm569_vm13 = vmor %vm567_vm12, %vm568_vm11 }
 0xc06   :  { %v564_v38 = vsub.f32 1.0, %v563_v36 }
 0xc08   :  { %v565_v39 = vmul.f32 %v1488_v35, %v564_v38 }
 0xc0a   :  { %v566_v40 = vadd.f32 %v1488_v35, %v565_v39 }
 0xc0c   :  { %v570_v43 = vsel %vm569_vm13, %v1488_v35, %v566_v40 }
 0xc0d   :  { %v575_v46 = vsel %vm572_vm14, %v574_v44, %v570_v43 }
 0xc0e   :  { %v578_v5 = vmul.f32 %v575_v46, %v523_v20  ;;  %v662_v20 = vrot.slane %v1936_v62, 6 }
 0xc6b   :  { %v581_v45 = vpop.permute.xlu1 %580 }
 0xc6c   :  { %v583_v47 = vmul.f32 %v581_v45, %v575_v46 }
 0xc6e   :  { %585 = vrot.lane.b32.xlu2 %v583_v47, %s1738_s19  ;;  %v129_v47 = vld [vmem:[#allocation8 + $0x10] sm:$0xff] }
 0xcc8   :  { %v586_v48 = vpop.permute.xlu2 %585 }
 0xcc9   :  { %v588_v49 = vadd.f32 %v586_v48, %v578_v5  ;;  %v128_v5 = vld [vmem:[#allocation8 + $0x8] sm:$0xff]  ;;  %v127_v48 = vld [vmem:[#allocation8] sm:$0xff] }
 0xccb   :  { %1489 = vtanh.f32 %v588_v49 }
 0xcd1   :  { %v1490_v50 = vpop.eup %1489 }
 0xcd2   :  { %591 = vrot.lane.b32.xlu0 %v1490_v50, %s1738_s19 }
 0xd44   :  { %v592_v55 = vpop.permute.xlu0 %591 }
 0xd45   :  { %v594_v56 = vmul.f32 %v592_v55, %v575_v46  ;;  %v130_v46 = vld [vmem:[#allocation8 + $0x18] sm:$0xff]  ;;  %v221_v55 = vadd.f32 %v1440_v54, %v1980_v53 }
 0xd46   :  { %740 = vmatpush.msra.mxu3 %v130_v46 }
 0xd47   :  { %596 = vrot.lane.b32.xlu1 %v594_v56, %s1740_s3 }
 0xd48   :  { %741 = vmatpush.msra.mxu3 %v129_v47 }
 0xd4a   :  { %742 = vmatpush.msra.mxu3 %v128_v5 }
 0xd4c   :  { %743 = vmatpush.msra.mxu3 %v127_v48  ;;  %v853_v48 = vrot.slane %v1980_v53, 4 }
 0xdb9   :  { %v597_v57 = vpop.permute.xlu1 %596 }
 0xdba   :  { %1401 = vmatmul.msk.f32.vlgmr.msra.gmra.mxu1 %vm280_vm7, %v597_v57 }
 0xe37   :  { %v619_v31 = vpop.f32.mrf.mxu1 }
 0xe38   :  { %v620_v60 = vadd.f32 %v619_v31, %v598_v30 }
 0xe3a   :  { %1491 = vtanh.f32 %v620_v60  ;;  %v1402_v37 = vmul.f32 -1.442695, %v620_v60 }
 0xe3c   :  { %1493 = vpow2.f32 %v1402_v37 }
 0xe40   :  { %v1492_v32 = vpop.eup %1491 }
 0xe41   :  { %644 = vrot.lane.b32.xlu2 %v1492_v32, %s1738_s19 }
 0xe42   :  { %v1494_v61 = vpop.eup %1493 }
 0xe43   :  { %v625_v63 = vadd.f32 1.0, %v1494_v61 }
 0xe45   :  { %1495 = vrcp.f32 %v625_v63  ;;  %v637_v7 = vand.u32 2147483648, %v625_v63  ;;  %vm631_vm2 = vweird.f32 %v625_v63  ;;  %v635_v8 = vand.u32 2147483647, %v625_v63 }
 0xe47   :  { %v638_v10 = vor.u32 1.1754944e-38, %v637_v7  ;;  %vm636_vm4 = vcmp.eq.f32.partialorder %v635_v8, 8.507059e+37 }
 0xe4b   :  { %v1496_v0 = vpop.eup %1495 }
 0xe4c   :  { %v627_v1 = vmul.f32 %v1496_v0, %v625_v63  ;;  %vm632_vm15 = vweird.f32 %v1496_v0 }
 0xe4d   :  { %vm633_vm3 = vmor %vm631_vm2, %vm632_vm15 }
 0xe4e   :  { %v628_v2 = vsub.f32 1.0, %v627_v1 }
 0xe50   :  { %v629_v4 = vmul.f32 %v1496_v0, %v628_v2 }
 0xe52   :  { %v630_v6 = vadd.f32 %v1496_v0, %v629_v4 }
 0xe54   :  { %v634_v9 = vsel %vm633_vm3, %v1496_v0, %v630_v6 }
 0xe55   :  { %v639_v3 = vsel %vm636_vm4, %v638_v10, %v634_v9 }
 0xe56   :  { %v642_v13 = vmul.f32 %v639_v3, %v588_v49 }
 0xe9b   :  { %v645_v11 = vpop.permute.xlu2 %644 }
 0xe9c   :  { %v647_v12 = vmul.f32 %v645_v11, %v639_v3 }
 0xe9e   :  { %649 = vrot.lane.b32.xlu0 %v647_v12, %s1738_s19 }
 0xf10   :  { %v650_v14 = vpop.permute.xlu0 %649 }
 0xf11   :  { %v652_v15 = vadd.f32 %v650_v14, %v642_v13  ;;  %v134_v13 = vld [vmem:[#allocation10 + $0x18] sm:$0xff]  ;;  %v133_v14 = vld [vmem:[#allocation10 + $0x10] sm:$0xff] }
 0xf12   :  { %805 = vmatpush.msra.mxu0 %v134_v13  ;;  %869 = vmatpush.msrb.mxu1 %v134_v13 }
 0xf13   :  { %1497 = vtanh.f32 %v652_v15  ;;  %933 = vmatpush.msrb.mxu2 %v134_v13  ;;  %995 = vmatpush.msrb.mxu3 %v134_v13 }
 0xf14   :  { %806 = vmatpush.msra.mxu0 %v133_v14  ;;  %870 = vmatpush.msrb.mxu1 %v133_v14 }
 0xf15   :  { %934 = vmatpush.msrb.mxu2 %v133_v14  ;;  %996 = vmatpush.msrb.mxu3 %v133_v14 }
 0xf19   :  { %v1498_v16 = vpop.eup %1497 }
 0xf1a   :  { %655 = vrot.lane.b32.xlu1 %v1498_v16, %s1738_s19  ;;  %v131_v16 = vld [vmem:[#allocation10] sm:$0xff] }
 0xf8c   :  { %v656_v17 = vpop.permute.xlu1 %655 }
 0xf8d   :  { %v658_v18 = vmul.f32 %v656_v17, %v639_v3 }
 0xf8f   :  { %660 = vrot.lane.b32.xlu2 %v658_v18, %s1740_s3 }
 0xfe9   :  { %v661_v19 = vpop.permute.xlu2 %660 }
 0xfea   :  { %1403 = vmatmul.msk.f32.vlgmr.msra.gmra.mxu2 %vm280_vm7, %v661_v19 }
0x106d   :  { %v683_v21 = vpop.f32.mrf.mxu2 }
0x106e   :  { %v684_v22 = vadd.f32 %v683_v21, %v662_v20  ;;  %v789_v20 = vrot.slane %v1980_v53, 2 }
0x1070   :  { %1499 = vtanh.f32 %v684_v22  ;;  %v1404_v24 = vmul.f32 -1.442695, %v684_v22 }
0x1072   :  { %1501 = vpow2.f32 %v1404_v24 }
0x1076   :  { %v1500_v23 = vpop.eup %1499 }
0x1077   :  { %708 = vrot.lane.b32.xlu0 %v1500_v23, %s1738_s19 }
0x1078   :  { %v1502_v25 = vpop.eup %1501 }
0x1079   :  { %v689_v26 = vadd.f32 1.0, %v1502_v25 }
0x107b   :  { %1503 = vrcp.f32 %v689_v26  ;;  %v701_v35 = vand.u32 2147483648, %v689_v26  ;;  %vm695_vm6 = vweird.f32 %v689_v26  ;;  %v699_v62 = vand.u32 2147483647, %v689_v26 }
0x107d   :  { %v702_v38 = vor.u32 1.1754944e-38, %v701_v35  ;;  %vm700_vm9 = vcmp.eq.f32.partialorder %v699_v62, 8.507059e+37 }
0x1081   :  { %v1504_v27 = vpop.eup %1503 }
0x1082   :  { %v691_v28 = vmul.f32 %v1504_v27, %v689_v26  ;;  %vm696_vm5 = vweird.f32 %v1504_v27 }
0x1083   :  { %vm697_vm8 = vmor %vm695_vm6, %vm696_vm5 }
0x1084   :  { %v692_v29 = vsub.f32 1.0, %v691_v28 }
0x1086   :  { %v693_v33 = vmul.f32 %v1504_v27, %v692_v29 }
0x1088   :  { %v694_v34 = vadd.f32 %v1504_v27, %v693_v33 }
0x108a   :  { %v698_v36 = vsel %vm697_vm8, %v1504_v27, %v694_v34 }
0x108b   :  { %v703_v40 = vsel %vm700_vm9, %v702_v38, %v698_v36 }
0x108c   :  { %v706_v42 = vmul.f32 %v703_v40, %v652_v15  ;;  %v132_v15 = vld [vmem:[#allocation10 + $0x8] sm:$0xff] }
0x108d   :  { %807 = vmatpush.msra.mxu0 %v132_v15  ;;  %871 = vmatpush.msrb.mxu1 %v132_v15 }
0x108e   :  { %935 = vmatpush.msrb.mxu2 %v132_v15  ;;  %997 = vmatpush.msrb.mxu3 %v132_v15 }
0x108f   :  { %808 = vmatpush.msra.mxu0 %v131_v16  ;;  %872 = vmatpush.msrb.mxu1 %v131_v16 }
0x1090   :  { %936 = vmatpush.msrb.mxu2 %v131_v16  ;;  %998 = vmatpush.msrb.mxu3 %v131_v16 }
0x1091   :  { %1060 = vmatpush.msrb.mxu0 %v134_v13  ;;  %1124 = vmatpush.msra.mxu1 %v134_v13 }
0x1092   :  { %1188 = vmatpush.msra.mxu2 %v134_v13 }
0x1093   :  { %1061 = vmatpush.msrb.mxu0 %v133_v14  ;;  %1125 = vmatpush.msra.mxu1 %v133_v14 }
0x1094   :  { %1189 = vmatpush.msra.mxu2 %v133_v14 }
0x1095   :  { %1062 = vmatpush.msrb.mxu0 %v132_v15  ;;  %1126 = vmatpush.msra.mxu1 %v132_v15 }
0x1096   :  { %1190 = vmatpush.msra.mxu2 %v132_v15 }
0x1097   :  { %1063 = vmatpush.msrb.mxu0 %v131_v16  ;;  %1127 = vmatpush.msra.mxu1 %v131_v16 }
0x1098   :  { %1191 = vmatpush.msra.mxu2 %v131_v16 }
0x10e9   :  { %v709_v39 = vpop.permute.xlu0 %708 }
0x10ea   :  { %v711_v41 = vmul.f32 %v709_v39, %v703_v40 }
0x10ec   :  { %713 = vrot.lane.b32.xlu1 %v711_v41, %s1738_s19 }
0x115e   :  { %v714_v43 = vpop.permute.xlu1 %713 }
0x115f   :  { %v716_v44 = vadd.f32 %v714_v43, %v706_v42 }
0x1161   :  { %1505 = vtanh.f32 %v716_v44 }
0x1167   :  { %v1506_v45 = vpop.eup %1505 }
0x1168   :  { %719 = vrot.lane.b32.xlu2 %v1506_v45, %s1738_s19 }
0x11c2   :  { %v720_v49 = vpop.permute.xlu2 %719 }
0x11c3   :  { %v722_v50 = vmul.f32 %v720_v49, %v703_v40 }
0x11c5   :  { %724 = vrot.lane.b32.xlu0 %v722_v50, %s1740_s3 }
0x1237   :  { %v725_v51 = vpop.permute.xlu0 %724 }
0x1238   :  { %1405 = vmatmul.msk.f32.vlgmr.msra.gmra.mxu3 %vm280_vm7, %v725_v51 }
0x1239   :  { %1253 = vmatpush.msra.mxu3 %v134_v13 }
0x123b   :  { %1254 = vmatpush.msra.mxu3 %v133_v14 }
0x123d   :  { %1255 = vmatpush.msra.mxu3 %v132_v15 }
0x123f   :  { %1256 = vmatpush.msra.mxu3 %v131_v16 }
0x12bb   :  { %v745_v56 = vpop.f32.mrf.mxu3 }
0x12bc   :  { %v746_v57 = vadd.f32 %v745_v56, %v221_v55 }
0x12be   :  { %1507 = vtanh.f32 %v746_v57  ;;  %v1406_v31 = vmul.f32 -1.442695, %v746_v57 }
0x12c0   :  { %1509 = vpow2.f32 %v1406_v31 }
0x12c4   :  { %v1508_v30 = vpop.eup %1507 }
0x12c5   :  { %770 = vrot.lane.b32.xlu1 %v1508_v30, %s1738_s19 }
0x12c6   :  { %v1510_v60 = vpop.eup %1509 }
0x12c7   :  { %v751_v32 = vadd.f32 1.0, %v1510_v60 }
0x12c9   :  { %1511 = vrcp.f32 %v751_v32  ;;  %v763_v1 = vand.u32 2147483648, %v751_v32  ;;  %vm757_vm11 = vweird.f32 %v751_v32  ;;  %v761_v2 = vand.u32 2147483647, %v751_v32 }
0x12cb   :  { %v764_v6 = vor.u32 1.1754944e-38, %v763_v1  ;;  %vm762_vm13 = vcmp.eq.f32.partialorder %v761_v2, 8.507059e+37 }
0x12cf   :  { %v1512_v37 = vpop.eup %1511 }
0x12d0   :  { %v753_v58 = vmul.f32 %v1512_v37, %v751_v32  ;;  %vm758_vm10 = vweird.f32 %v1512_v37 }
0x12d1   :  { %vm759_vm12 = vmor %vm757_vm11, %vm758_vm10 }
0x12d2   :  { %v754_v61 = vsub.f32 1.0, %v753_v58 }
0x12d4   :  { %v755_v63 = vmul.f32 %v1512_v37, %v754_v61 }
0x12d6   :  { %v756_v0 = vadd.f32 %v1512_v37, %v755_v63 }
0x12d8   :  { %v760_v4 = vsel %vm759_vm12, %v1512_v37, %v756_v0 }
0x12d9   :  { %v765_v8 = vsel %vm762_vm13, %v764_v6, %v760_v4  ;;  %vm1312_vm13 = vcmask 1043456  }
0x12da   :  { %v768_v10 = vmul.f32 %v765_v8, %v716_v44 }
0x1337   :  { %v771_v7 = vpop.permute.xlu1 %770 }
0x1338   :  { %v773_v9 = vmul.f32 %v771_v7, %v765_v8 }
0x133a   :  { %775 = vrot.lane.b32.xlu2 %v773_v9, %s1738_s19 }
0x1394   :  { %v776_v11 = vpop.permute.xlu2 %775 }
0x1395   :  { %v1988_v3 = vadd.f32 %v776_v11, %v768_v10 }
0x1397   :  { %1513 = vtanh.f32 %v1988_v3 }
0x139d   :  { %v1514_v12 = vpop.eup %1513 }
0x139e   :  { %781 = vrot.lane.b32.xlu0 %v1514_v12, %s1738_s19 }
0x1410   :  { %v782_v17 = vpop.permute.xlu0 %781 }
0x1411   :  { %v784_v18 = vmul.f32 %v782_v17, %v765_v8 }
0x1413   :  { %786 = vrot.lane.b32.xlu1 %v784_v18, %s1740_s3 }
0x1485   :  { %v787_v19 = vpop.permute.xlu1 %786 }
0x1486   :  { %1407 = vmatmul.msk.f32.vlgmr.msra.gmra.mxu0 %vm280_vm7, %v787_v19 }
0x1503   :  { %v810_v21 = vpop.f32.mrf.mxu0 }
0x1504   :  { %v811_v22 = vadd.f32 %v810_v21, %v789_v20 }
0x1506   :  { %1515 = vtanh.f32 %v811_v22  ;;  %v1408_v24 = vmul.f32 -1.442695, %v811_v22 }
0x1508   :  { %1517 = vpow2.f32 %v1408_v24 }
0x150c   :  { %v1516_v23 = vpop.eup %1515 }
0x150d   :  { %835 = vrot.lane.b32.xlu2 %v1516_v23, %s1738_s19 }
0x150e   :  { %v1518_v25 = vpop.eup %1517 }
0x150f   :  { %v816_v26 = vadd.f32 1.0, %v1518_v25 }
0x1511   :  { %1519 = vrcp.f32 %v816_v26  ;;  %v828_v35 = vand.u32 2147483648, %v816_v26  ;;  %vm822_vm15 = vweird.f32 %v816_v26  ;;  %v826_v62 = vand.u32 2147483647, %v816_v26 }
0x1513   :  { %v829_v38 = vor.u32 1.1754944e-38, %v828_v35  ;;  %vm827_vm3 = vcmp.eq.f32.partialorder %v826_v62, 8.507059e+37 }
0x1517   :  { %v1520_v27 = vpop.eup %1519 }
0x1518   :  { %v818_v28 = vmul.f32 %v1520_v27, %v816_v26  ;;  %vm823_vm14 = vweird.f32 %v1520_v27 }
0x1519   :  { %vm824_vm2 = vmor %vm822_vm15, %vm823_vm14 }
0x151a   :  { %v819_v29 = vsub.f32 1.0, %v818_v28 }
0x151c   :  { %v820_v33 = vmul.f32 %v1520_v27, %v819_v29 }
0x151e   :  { %v821_v34 = vadd.f32 %v1520_v27, %v820_v33 }
0x1520   :  { %v825_v36 = vsel %vm824_vm2, %v1520_v27, %v821_v34 }
0x1521   :  { %v830_v40 = vsel %vm827_vm3, %v829_v38, %v825_v36 }
0x1522   :  { %v833_v42 = vmul.f32 %v830_v40, %v1988_v3  ;;  %v917_v3 = vrot.slane %v1980_v53, 6 }
0x1567   :  { %v836_v39 = vpop.permute.xlu2 %835 }
0x1568   :  { %v838_v41 = vmul.f32 %v836_v39, %v830_v40 }
0x156a   :  { %840 = vrot.lane.b32.xlu0 %v838_v41, %s1738_s19 }
0x15dc   :  { %v841_v43 = vpop.permute.xlu0 %840 }
0x15dd   :  { %v843_v44 = vadd.f32 %v841_v43, %v833_v42  ;;  %v2021_v43 = vadd.f32 %v1976_v52, %v1959_v59 }
0x15df   :  { %1521 = vtanh.f32 %v843_v44 }
0x15e5   :  { %v1522_v45 = vpop.eup %1521 }
0x15e6   :  { %846 = vrot.lane.b32.xlu1 %v1522_v45, %s1738_s19 }
0x1658   :  { %v847_v46 = vpop.permute.xlu1 %846 }
0x1659   :  { %v1999_v47 = vmul.f32 %v847_v46, %v830_v40 }
0x165b   :  { %851 = vrot.lane.b32.xlu2 %v1999_v47, %s1740_s3 }
0x16b5   :  { %v852_v5 = vpop.permute.xlu2 %851 }
0x16b6   :  { %1409 = vmatmul.msk.f32.vlgmr.msrb.gmra.mxu1 %vm280_vm7, %v852_v5 }
0x1733   :  { %v874_v49 = vpop.f32.mrf.mxu1 }
0x1734   :  { %v875_v50 = vadd.f32 %v874_v49, %v853_v48 }
0x1736   :  { %1523 = vtanh.f32 %v875_v50  ;;  %v1410_v54 = vmul.f32 -1.442695, %v875_v50 }
0x1738   :  { %1525 = vpow2.f32 %v1410_v54 }
0x173c   :  { %v1524_v51 = vpop.eup %1523 }
0x173d   :  { %899 = vrot.lane.b32.xlu0 %v1524_v51, %s1738_s19 }
0x173e   :  { %v1526_v55 = vpop.eup %1525 }
0x173f   :  { %v880_v56 = vadd.f32 1.0, %v1526_v55 }
0x1741   :  { %1527 = vrcp.f32 %v880_v56  ;;  %v892_v37 = vand.u32 2147483648, %v880_v56  ;;  %vm886_vm5 = vweird.f32 %v880_v56  ;;  %v890_v58 = vand.u32 2147483647, %v880_v56 }
0x1743   :  { %v893_v63 = vor.u32 1.1754944e-38, %v892_v37  ;;  %vm891_vm8 = vcmp.eq.f32.partialorder %v890_v58, 8.507059e+37 }
0x1747   :  { %v1528_v57 = vpop.eup %1527 }
0x1748   :  { %v882_v30 = vmul.f32 %v1528_v57, %v880_v56  ;;  %vm887_vm4 = vweird.f32 %v1528_v57 }
0x1749   :  { %vm888_vm6 = vmor %vm886_vm5, %vm887_vm4  ;;  %vm1314_vm4 = vcmask 1045504  }
0x174a   :  { %v883_v31 = vsub.f32 1.0, %v882_v30 }
0x174c   :  { %v884_v60 = vmul.f32 %v1528_v57, %v883_v31 }
0x174e   :  { %v885_v32 = vadd.f32 %v1528_v57, %v884_v60 }
0x1750   :  { %v889_v61 = vsel %vm888_vm6, %v1528_v57, %v885_v32 }
0x1751   :  { %v894_v1 = vsel %vm891_vm8, %v893_v63, %v889_v61 }
0x1752   :  { %v897_v4 = vmul.f32 %v894_v1, %v843_v44 }
0x17af   :  { %v900_v0 = vpop.permute.xlu0 %899 }
0x17b0   :  { %v902_v2 = vmul.f32 %v900_v0, %v894_v1 }
0x17b2   :  { %904 = vrot.lane.b32.xlu1 %v902_v2, %s1738_s19 }
0x1824   :  { %v905_v6 = vpop.permute.xlu1 %904 }
0x1825   :  { %v907_v7 = vadd.f32 %v905_v6, %v897_v4  ;;  %v1044_v6 = vrot.slane %v2021_v43, 2 }
0x1827   :  { %1529 = vtanh.f32 %v907_v7 }
0x182d   :  { %v1530_v8 = vpop.eup %1529 }
0x182e   :  { %910 = vrot.lane.b32.xlu2 %v1530_v8, %s1738_s19 }
0x1888   :  { %v911_v9 = vpop.permute.xlu2 %910 }
0x1889   :  { %v913_v10 = vmul.f32 %v911_v9, %v894_v1 }
0x188b   :  { %915 = vrot.lane.b32.xlu0 %v913_v10, %s1740_s3  ;;  %v1298_v62 = vrot.slane %v913_v10, 6 }
0x188d   :  { %v1311_v40 = vsel %vm150_vm0, %v1999_v47, %v1298_v62 }
0x18fd   :  { %v916_v11 = vpop.permute.xlu0 %915 }
0x18fe   :  { %1411 = vmatmul.msk.f32.vlgmr.msrb.gmra.mxu2 %vm280_vm7, %v916_v11 }
0x1981   :  { %v938_v12 = vpop.f32.mrf.mxu2 }
0x1982   :  { %v939_v13 = vadd.f32 %v938_v12, %v917_v3 }
0x1984   :  { %1531 = vtanh.f32 %v939_v13  ;;  %v1412_v15 = vmul.f32 -1.442695, %v939_v13 }
0x1986   :  { %1533 = vpow2.f32 %v1412_v15 }
0x198a   :  { %v1532_v14 = vpop.eup %1531 }
0x198b   :  { %963 = vrot.lane.b32.xlu1 %v1532_v14, %s1738_s19 }
0x198c   :  { %v1534_v16 = vpop.eup %1533 }
0x198d   :  { %v944_v17 = vadd.f32 1.0, %v1534_v16 }
0x198f   :  { %1535 = vrcp.f32 %v944_v17  ;;  %v956_v23 = vand.u32 2147483648, %v944_v17  ;;  %vm950_vm10 = vweird.f32 %v944_v17  ;;  %v954_v53 = vand.u32 2147483647, %v944_v17 }
0x1991   :  { %v957_v25 = vor.u32 1.1754944e-38, %v956_v23  ;;  %vm955_vm12 = vcmp.eq.f32.partialorder %v954_v53, 8.507059e+37 }
0x1995   :  { %v1536_v18 = vpop.eup %1535 }
0x1996   :  { %v946_v19 = vmul.f32 %v1536_v18, %v944_v17  ;;  %vm951_vm9 = vweird.f32 %v1536_v18 }
0x1997   :  { %vm952_vm11 = vmor %vm950_vm10, %vm951_vm9 }
0x1998   :  { %v947_v20 = vsub.f32 1.0, %v946_v19 }
0x199a   :  { %v948_v21 = vmul.f32 %v1536_v18, %v947_v20 }
0x199c   :  { %v949_v22 = vadd.f32 %v1536_v18, %v948_v21 }
0x199e   :  { %v953_v24 = vsel %vm952_vm11, %v1536_v18, %v949_v22 }
0x199f   :  { %v958_v27 = vsel %vm955_vm12, %v957_v25, %v953_v24 }
0x19a0   :  { %v961_v29 = vmul.f32 %v958_v27, %v907_v7 }
0x19fd   :  { %v964_v26 = vpop.permute.xlu1 %963 }
0x19fe   :  { %v966_v28 = vmul.f32 %v964_v26, %v958_v27 }
0x1a00   :  { %968 = vrot.lane.b32.xlu2 %v966_v28, %s1738_s19 }
0x1a5a   :  { %v969_v33 = vpop.permute.xlu2 %968 }
0x1a5b   :  { %v971_v34 = vadd.f32 %v969_v33, %v961_v29  ;;  %v1108_v33 = vrot.slane %v2021_v43, 4 }
0x1a5d   :  { %1537 = vtanh.f32 %v971_v34 }
0x1a63   :  { %v1538_v35 = vpop.eup %1537 }
0x1a64   :  { %974 = vrot.lane.b32.xlu0 %v1538_v35, %s1738_s19 }
0x1ad6   :  { %v975_v36 = vpop.permute.xlu0 %974 }
0x1ad7   :  { %v977_v38 = vmul.f32 %v975_v36, %v958_v27 }
0x1ad9   :  { %v1300_v39 = vrot.slane %v977_v38, 4  ;;  %979 = vrot.lane.b32.xlu1 %v977_v38, %s1740_s3 }
0x1adb   :  { %v1313_v41 = vsel %vm1312_vm13, %v1311_v40, %v1300_v39 }
0x1b4b   :  { %v980_v42 = vpop.permute.xlu1 %979 }
0x1b4c   :  { %1413 = vmatmul.msk.f32.vlgmr.msrb.gmra.mxu3 %vm280_vm7, %v980_v42 }
0x1bcf   :  { %v1000_v44 = vpop.f32.mrf.mxu3 }
0x1bd0   :  { %v1001_v45 = vadd.f32 %v1000_v44, %v2021_v43 }
0x1bd2   :  { %1539 = vtanh.f32 %v1001_v45  ;;  %v1414_v5 = vmul.f32 -1.442695, %v1001_v45 }
0x1bd4   :  { %1541 = vpow2.f32 %v1414_v5 }
0x1bd8   :  { %v1540_v46 = vpop.eup %1539 }
0x1bd9   :  { %1025 = vrot.lane.b32.xlu2 %v1540_v46, %s1738_s19 }
0x1bda   :  { %v1542_v48 = vpop.eup %1541 }
0x1bdb   :  { %v1006_v47 = vadd.f32 1.0, %v1542_v48 }
0x1bdd   :  { %1543 = vrcp.f32 %v1006_v47  ;;  %v1018_v59 = vand.u32 2147483648, %v1006_v47  ;;  %vm1012_vm15 = vweird.f32 %v1006_v47  ;;  %v1016_v52 = vand.u32 2147483647, %v1006_v47 }
0x1bdf   :  { %v1019_v57 = vor.u32 1.1754944e-38, %v1018_v59  ;;  %vm1017_vm3 = vcmp.eq.f32.partialorder %v1016_v52, 8.507059e+37 }
0x1be3   :  { %v1544_v49 = vpop.eup %1543 }
0x1be4   :  { %v1008_v50 = vmul.f32 %v1544_v49, %v1006_v47  ;;  %vm1013_vm14 = vweird.f32 %v1544_v49 }
0x1be5   :  { %vm1014_vm2 = vmor %vm1012_vm15, %vm1013_vm14 }
0x1be6   :  { %v1009_v51 = vsub.f32 1.0, %v1008_v50 }
0x1be8   :  { %v1010_v54 = vmul.f32 %v1544_v49, %v1009_v51 }
0x1bea   :  { %v1011_v55 = vadd.f32 %v1544_v49, %v1010_v54 }
0x1bec   :  { %v1015_v56 = vsel %vm1014_vm2, %v1544_v49, %v1011_v55 }
0x1bed   :  { %v1020_v31 = vsel %vm1017_vm3, %v1019_v57, %v1015_v56 }
0x1bee   :  { %v1023_v32 = vmul.f32 %v1020_v31, %v971_v34 }
0x1c33   :  { %v1026_v30 = vpop.permute.xlu2 %1025 }
0x1c34   :  { %v1028_v60 = vmul.f32 %v1026_v30, %v1020_v31 }
0x1c36   :  { %1030 = vrot.lane.b32.xlu0 %v1028_v60, %s1738_s19 }
0x1ca8   :  { %v1031_v37 = vpop.permute.xlu0 %1030 }
0x1ca9   :  { %v1033_v58 = vadd.f32 %v1031_v37, %v1023_v32 }
0x1cab   :  { %1545 = vtanh.f32 %v1033_v58 }
0x1cb1   :  { %v1546_v61 = vpop.eup %1545 }
0x1cb2   :  { %1036 = vrot.lane.b32.xlu1 %v1546_v61, %s1738_s19 }
0x1d24   :  { %v1037_v63 = vpop.permute.xlu1 %1036 }
0x1d25   :  { %v1039_v0 = vmul.f32 %v1037_v63, %v1020_v31  ;;  %v1172_v31 = vrot.slane %v2021_v43, 6 }
0x1d27   :  { %v1302_v1 = vrot.slane %v1039_v0, 2  ;;  %1041 = vrot.lane.b32.xlu2 %v1039_v0, %s1740_s3 }
0x1d29   :  { %v2029_v2 = vsel %vm1314_vm4, %v1313_v41, %v1302_v1 }
0x1d81   :  { %v1042_v4 = vpop.permute.xlu2 %1041 }
0x1d82   :  { %1415 = vmatmul.msk.f32.vlgmr.msrb.gmra.mxu0 %vm280_vm7, %v1042_v4 }
0x1dff   :  { %v1065_v7 = vpop.f32.mrf.mxu0 }
0x1e00   :  { %v1066_v8 = vadd.f32 %v1065_v7, %v1044_v6 }
0x1e02   :  { %1547 = vtanh.f32 %v1066_v8  ;;  %v1416_v10 = vmul.f32 -1.442695, %v1066_v8 }
0x1e04   :  { %1549 = vpow2.f32 %v1416_v10 }
0x1e08   :  { %v1548_v9 = vpop.eup %1547 }
0x1e09   :  { %1090 = vrot.lane.b32.xlu0 %v1548_v9, %s1738_s19 }
0x1e0a   :  { %v1550_v11 = vpop.eup %1549 }
0x1e0b   :  { %v1071_v3 = vadd.f32 1.0, %v1550_v11 }
0x1e0d   :  { %1551 = vrcp.f32 %v1071_v3  ;;  %v1083_v17 = vand.u32 2147483648, %v1071_v3  ;;  %vm1077_vm6 = vweird.f32 %v1071_v3  ;;  %v1081_v18 = vand.u32 2147483647, %v1071_v3 }
0x1e0f   :  { %v1084_v20 = vor.u32 1.1754944e-38, %v1083_v17  ;;  %vm1082_vm9 = vcmp.eq.f32.partialorder %v1081_v18, 8.507059e+37 }
0x1e13   :  { %v1552_v12 = vpop.eup %1551 }
0x1e14   :  { %v1073_v13 = vmul.f32 %v1552_v12, %v1071_v3  ;;  %vm1078_vm5 = vweird.f32 %v1552_v12 }
0x1e15   :  { %vm1079_vm8 = vmor %vm1077_vm6, %vm1078_vm5 }
0x1e16   :  { %v1074_v14 = vsub.f32 1.0, %v1073_v13 }
0x1e18   :  { %v1075_v15 = vmul.f32 %v1552_v12, %v1074_v14 }
0x1e1a   :  { %v1076_v16 = vadd.f32 %v1552_v12, %v1075_v15 }
0x1e1c   :  { %v1080_v19 = vsel %vm1079_vm8, %v1552_v12, %v1076_v16 }
0x1e1d   :  { %v1085_v22 = vsel %vm1082_vm9, %v1084_v20, %v1080_v19 }
0x1e1e   :  { %v1088_v53 = vmul.f32 %v1085_v22, %v1033_v58 }
0x1e7b   :  { %v1091_v21 = vpop.permute.xlu0 %1090 }
0x1e7c   :  { %v1093_v23 = vmul.f32 %v1091_v21, %v1085_v22 }
0x1e7e   :  { %1095 = vrot.lane.b32.xlu1 %v1093_v23, %s1738_s19 }
0x1ef0   :  { %v1096_v24 = vpop.permute.xlu1 %1095 }
0x1ef1   :  { %v1098_v25 = vadd.f32 %v1096_v24, %v1088_v53  ;;  %v1441_v53 = vld [vmem:[%s2098_s7] ss:$0 sm:$0xff] }
0x1ef3   :  { %1553 = vtanh.f32 %v1098_v25 }
0x1ef9   :  { %v1554_v26 = vpop.eup %1553 }
0x1efa   :  { %1101 = vrot.lane.b32.xlu2 %v1554_v26, %s1738_s19 }
0x1f54   :  { %v1102_v27 = vpop.permute.xlu2 %1101 }
0x1f55   :  { %v2036_v28 = vmul.f32 %v1102_v27, %v1085_v22 }
0x1f57   :  { %1106 = vrot.lane.b32.xlu0 %v2036_v28, %s1740_s3 }
0x1fc9   :  { %v1107_v29 = vpop.permute.xlu0 %1106 }
0x1fca   :  { %1417 = vmatmul.msk.f32.vlgmr.msra.gmra.mxu1 %vm280_vm7, %v1107_v29 }
0x2047   :  { %v1129_v34 = vpop.f32.mrf.mxu1 }
0x2048   :  { %v1130_v35 = vadd.f32 %v1129_v34, %v1108_v33  ;;  %v1322_v33 = vld [vmem:[%s2102_s11 + $0x18] sm:$0xff]  ;;  %v1321_v34 = vld [vmem:[%s2102_s11 + $0x10] sm:$0xff] }
0x2049   :  { %1349 = vmatpush.msra.mxu0 %v1322_v33 }
0x204a   :  { %1555 = vtanh.f32 %v1130_v35  ;;  %v1418_v36 = vmul.f32 -1.442695, %v1130_v35  ;;  %v1320_v35 = vld [vmem:[%s2102_s11 + $0x8] sm:$0xff] }
0x204b   :  { %1350 = vmatpush.msra.mxu0 %v1321_v34 }
0x204c   :  { %1557 = vpow2.f32 %v1418_v36 }
0x204d   :  { %1351 = vmatpush.msra.mxu0 %v1320_v35 }
0x2050   :  { %v1556_v62 = vpop.eup %1555 }
0x2051   :  { %1154 = vrot.lane.b32.xlu1 %v1556_v62, %s1738_s19 }
0x2052   :  { %v1558_v38 = vpop.eup %1557 }
0x2053   :  { %v1135_v39 = vadd.f32 1.0, %v1558_v38 }
0x2055   :  { %1559 = vrcp.f32 %v1135_v39  ;;  %v1147_v46 = vand.u32 2147483648, %v1135_v39  ;;  %vm1141_vm11 = vweird.f32 %v1135_v39  ;;  %v1145_v5 = vand.u32 2147483647, %v1135_v39 }
0x2057   :  { %v1148_v47 = vor.u32 1.1754944e-38, %v1147_v46  ;;  %vm1146_vm14 = vcmp.eq.f32.partialorder %v1145_v5, 8.507059e+37 }
0x205b   :  { %v1560_v40 = vpop.eup %1559 }
0x205c   :  { %v1137_v41 = vmul.f32 %v1560_v40, %v1135_v39  ;;  %vm1142_vm10 = vweird.f32 %v1560_v40 }
0x205d   :  { %vm1143_vm12 = vmor %vm1141_vm11, %vm1142_vm10 }
0x205e   :  { %v1138_v42 = vsub.f32 1.0, %v1137_v41 }
0x2060   :  { %v1139_v44 = vmul.f32 %v1560_v40, %v1138_v42 }
0x2062   :  { %v1140_v45 = vadd.f32 %v1560_v40, %v1139_v44 }
0x2064   :  { %v1144_v48 = vsel %vm1143_vm12, %v1560_v40, %v1140_v45 }
0x2065   :  { %v1149_v50 = vsel %vm1146_vm14, %v1148_v47, %v1144_v48 }
0x2066   :  { %v1152_v54 = vmul.f32 %v1149_v50, %v1098_v25 }
0x20c3   :  { %v1155_v49 = vpop.permute.xlu1 %1154 }
0x20c4   :  { %v1157_v51 = vmul.f32 %v1155_v49, %v1149_v50 }
0x20c6   :  { %1159 = vrot.lane.b32.xlu2 %v1157_v51, %s1738_s19 }
0x2120   :  { %v1160_v55 = vpop.permute.xlu2 %1159 }
0x2121   :  { %v1162_v59 = vadd.f32 %v1160_v55, %v1152_v54  ;;  %v1442_v55 = vld [vmem:[%s2103_s12] ss:$0 sm:$0xff]  ;;  %s1368_s12 = sshll.u32 %s2104_s13, 4  ;;  %s1369_s12 = int_to_ptr.hbm [resolvable:$true] %s1368_s12 }
0x2123   :  { %1561 = vtanh.f32 %v1162_v59 }
0x2129   :  { %v1562_v52 = vpop.eup %1561 }
0x212a   :  { %1165 = vrot.lane.b32.xlu0 %v1562_v52, %s1738_s19 }
0x219c   :  { %v1166_v56 = vpop.permute.xlu0 %1165 }
0x219d   :  { %v1168_v57 = vmul.f32 %v1166_v56, %v1149_v50 }
0x219f   :  { %1170 = vrot.lane.b32.xlu1 %v1168_v57, %s1740_s3  ;;  %v1304_v17 = vrot.slane %v1168_v57, 6 }
0x21a1   :  { %v1316_v21 = vsel %vm150_vm0, %v2036_v28, %v1304_v17 }
0x2211   :  { %v1171_v30 = vpop.permute.xlu1 %1170 }
0x2212   :  { %1419 = vmatmul.msk.f32.vlgmr.msra.gmra.mxu2 %vm280_vm7, %v1171_v30 }
0x2295   :  { %v1193_v60 = vpop.f32.mrf.mxu2 }
0x2296   :  { %v1194_v32 = vadd.f32 %v1193_v60, %v1172_v31 }
0x2298   :  { %1563 = vtanh.f32 %v1194_v32  ;;  %v1420_v58 = vmul.f32 -1.442695, %v1194_v32 }
0x229a   :  { %1565 = vpow2.f32 %v1420_v58 }
0x229e   :  { %v1564_v37 = vpop.eup %1563 }
0x229f   :  { %1218 = vrot.lane.b32.xlu2 %v1564_v37, %s1738_s19 }
0x22a0   :  { %v1566_v61 = vpop.eup %1565 }
0x22a1   :  { %v1199_v63 = vadd.f32 1.0, %v1566_v61 }
0x22a3   :  { %1567 = vrcp.f32 %v1199_v63  ;;  %v1211_v8 = vand.u32 2147483648, %v1199_v63  ;;  %vm1205_vm2 = vweird.f32 %v1199_v63  ;;  %v1209_v43 = vand.u32 2147483647, %v1199_v63 }
0x22a5   :  { %v1212_v10 = vor.u32 1.1754944e-38, %v1211_v8  ;;  %vm1210_vm5 = vcmp.eq.f32.partialorder %v1209_v43, 8.507059e+37 }
0x22a9   :  { %v1568_v0 = vpop.eup %1567 }
0x22aa   :  { %v1201_v1 = vmul.f32 %v1568_v0, %v1199_v63  ;;  %vm1206_vm15 = vweird.f32 %v1568_v0 }
0x22ab   :  { %vm1207_vm3 = vmor %vm1205_vm2, %vm1206_vm15 }
0x22ac   :  { %v1202_v4 = vsub.f32 1.0, %v1201_v1 }
0x22ae   :  { %v1203_v6 = vmul.f32 %v1568_v0, %v1202_v4 }
0x22b0   :  { %v1204_v7 = vadd.f32 %v1568_v0, %v1203_v6 }
0x22b2   :  { %v1208_v9 = vsel %vm1207_vm3, %v1568_v0, %v1204_v7 }
0x22b3   :  { %v1213_v3 = vsel %vm1210_vm5, %v1212_v10, %v1208_v9 }
0x22b4   :  { %v1216_v13 = vmul.f32 %v1213_v3, %v1162_v59 }
0x22f9   :  { %v1219_v11 = vpop.permute.xlu2 %1218 }
0x22fa   :  { %v1221_v12 = vmul.f32 %v1219_v11, %v1213_v3 }
0x22fc   :  { %1223 = vrot.lane.b32.xlu0 %v1221_v12, %s1738_s19 }
0x236e   :  { %v1224_v14 = vpop.permute.xlu0 %1223 }
0x236f   :  { %v1226_v15 = vadd.f32 %v1224_v14, %v1216_v13 }
0x2371   :  { %1569 = vtanh.f32 %v1226_v15 }
0x2377   :  { %v1570_v16 = vpop.eup %1569 }
0x2378   :  { %1229 = vrot.lane.b32.xlu1 %v1570_v16, %s1738_s19 }
0x23ea   :  { %v1230_v18 = vpop.permute.xlu1 %1229 }
0x23eb   :  { %v1232_v19 = vmul.f32 %v1230_v18, %v1213_v3 }
0x23ed   :  { %v1306_v20 = vrot.slane %v1232_v19, 4  ;;  %1237 = vrot.lane.b32.xlu2 %v1232_v19, %s1740_s3 }
0x23ef   :  { %v1317_v22 = vsel %vm1312_vm13, %v1316_v21, %v1306_v20 }
0x2447   :  { %v1238_v23 = vpop.permute.xlu2 %1237 }
0x2448   :  { %1421 = vmatmul.msk.f32.vlgmr.msra.gmra.mxu3 %vm280_vm7, %v1238_v23 }
0x24cb   :  { %v1258_v24 = vpop.f32.mrf.mxu3 }
0x24cc   :  { %v1259_v25 = vadd.f32 %v1441_v53, %v1258_v24 }
0x24ce   :  { %1571 = vtanh.f32 %v1259_v25  ;;  %v1422_v27 = vmul.f32 -1.442695, %v1259_v25 }
0x24d0   :  { %1573 = vpow2.f32 %v1422_v27 }
0x24d4   :  { %v1572_v26 = vpop.eup %1571 }
0x24d5   :  { %1283 = vrot.lane.b32.xlu0 %v1572_v26, %s1738_s19 }
0x24d6   :  { %v1574_v28 = vpop.eup %1573 }
0x24d7   :  { %v1264_v29 = vadd.f32 1.0, %v1574_v28 }
0x24d9   :  { %1575 = vrcp.f32 %v1264_v29  ;;  %v1276_v41 = vand.u32 2147483648, %v1264_v29  ;;  %vm1270_vm13 = vweird.f32 %v1264_v29  ;;  %v1274_v42 = vand.u32 2147483647, %v1264_v29 }
0x24db   :  { %v1277_v45 = vor.u32 1.1754944e-38, %v1276_v41  ;;  %vm1275_vm8 = vcmp.eq.f32.partialorder %v1274_v42, 8.507059e+37 }
0x24dd   :  { %1329 = vrot.lane.b32.xlu0 %v2029_v2, %s1740_s3  ;;  %v1319_v2 = vld [vmem:[%s2102_s11] sm:$0xff] }
0x24de   :  { %1352 = vmatpush.msra.mxu0 %v1319_v2 }
0x24df   :  { %v1576_v62 = vpop.eup %1575 }
0x24e0   :  { %v1266_v36 = vmul.f32 %v1576_v62, %v1264_v29  ;;  %vm1271_vm0 = vweird.f32 %v1576_v62 }
0x24e1   :  { %vm1272_vm6 = vmor %vm1270_vm13, %vm1271_vm0 }
0x24e2   :  { %v1267_v38 = vsub.f32 1.0, %v1266_v36 }
0x24e4   :  { %v1268_v39 = vmul.f32 %v1576_v62, %v1267_v38 }
0x24e6   :  { %v1269_v40 = vadd.f32 %v1576_v62, %v1268_v39 }
0x24e8   :  { %v1273_v44 = vsel %vm1272_vm6, %v1576_v62, %v1269_v40 }
0x24e9   :  { %v1278_v5 = vsel %vm1275_vm8, %v1277_v45, %v1273_v44 }
0x24ea   :  { %v1281_v49 = vmul.f32 %v1278_v5, %v1226_v15 }
0x2547   :  { %v1284_v46 = vpop.permute.xlu0 %1283 }
0x2548   :  { %v1286_v48 = vmul.f32 %v1284_v46, %v1278_v5 }
0x254a   :  { %1288 = vrot.lane.b32.xlu1 %v1286_v48, %s1738_s19 }
0x254f   :  { %v1330_v47 = vpop.permute.xlu0 %1329 }
0x2550   :  { %1423 = vmatmul.msk.f32.vlgmr.msra.gmra.mxu0 %vm280_vm7, %v1330_v47 }
0x25bc   :  { %v1289_v50 = vpop.permute.xlu1 %1288 }
0x25bd   :  { %v1291_v51 = vadd.f32 %v1289_v50, %v1281_v49 }
0x25bf   :  { %1577 = vtanh.f32 %v1291_v51 }
0x25c5   :  { %v1578_v54 = vpop.eup %1577 }
0x25c6   :  { %1294 = vrot.lane.b32.xlu2 %v1578_v54, %s1738_s19  ;;  %s1366_s19 = sshll.u32 %s1741_s21, 4  ;;  %s1367_s19 = int_to_ptr.vmem [resolvable:$true] %s1366_s19 }
0x25cd   :  { %v1354_v59 = vpop.f32.mrf.mxu0 }
0x25ce   :  { %v1355_v52 = vadd.f32 %v1442_v55, %v1354_v59 }
0x25d0   :  { %1360 = vst.msk [vmem:[#allocation11] sm:$0xff] %vm143_vm1, %v1355_v52 }
0x2620   :  { %v1295_v56 = vpop.permute.xlu2 %1294 }
0x2621   :  { %v1297_v57 = vmul.f32 %v1295_v56, %v1278_v5 }
0x2623   :  { %v1309_v30 = vrot.slane %v1297_v57, 2 }
0x2625   :  { %v1318_v31 = vsel %vm1314_vm4, %v1317_v22, %v1309_v30 }
0x2626   :  { %1331 = vrot.lane.b32.xlu1 %v1318_v31, %s1740_s3 }
0x2698   :  { %v1332_v60 = vpop.permute.xlu1 %1331 }
0x2699   :  { %1424 = vmatmul.msk.f32.gmra.mxu0 %vm280_vm7, %v1332_v60 }
0x2716   :  { %v1357_v32 = vpop.f32.mrf.mxu0 }
0x2717   :  { %v1358_v37 = vadd.f32 %v1442_v55, %v1357_v32 }
0x2719   :  { %1361 = vst.msk [vmem:[#allocation11 + $0x8] sm:$0xff] %vm143_vm1, %v1358_v37 }
0x271a   :  { %1374 = dma.vmem_to_hbm [thread:$0]  %s1367_s19, 256, %s1369_s12, [#allocation4], %s1732_s16, %s1732_s16, %s1733_s17  }
0x271b   :  { %1729 = dma.done.wait [#allocation4], 256  }
0x271c   :  { %1730 = vsyncadd [#allocation4], 4294967040 }
0x271d   :  { %1379 = vsyncpa [#allocation3], 1 }
0x271e   :  { %1380 = vsyncpa [#allocation6], 1 }
0x271f   :  { %1381 = vsyncpa [#allocation9], 1 }
0x2720   :  { %1382 = vsyncpa [#allocation4], 1 }

</bundles_post_ra>
